<compile_context>
chip_gen: v7x
topology: tpu7x:2x2x1
jax: 0.10.0
libtpu: 0.0.40
codegen_flags: <defaults>
</compile_context>

<pallas_src>
import math

import jax
import jax.numpy as jnp
from jax import lax
from jax.experimental import pallas as pl
from jax.experimental.pallas import tpu as pltpu


# ----------------------------------------------------------------------------
# The fused kernel: RNN -> (key|query|value) MLPs -> attention, all in VMEM.
# ----------------------------------------------------------------------------
def fused_attention_rnn_kernel(
    # inputs
    x2d_ref, xq_ref,
    wih_t_ref, whh_t_ref, b_rnn_ref,
    kw1_ref, kb1_ref, kw2_ref, kb2_ref,
    qw1_ref, qb1_ref, qw2_ref, qb2_ref,
    vw1_ref, vb1_ref, vw2_ref, vb2_ref,
    # outputs
    atfm2d_ref, attn_ref,
    # scratch (VMEM)
    oflat_sc, kmat_sc, qmat_sc, vmat_sc,
):
    f32 = jnp.float32
    slbs = x2d_ref.shape[0]
    bs = xq_ref.shape[0]
    sl = slbs // bs
    hs = whh_t_ref.shape[0]

    # ---- RNN: hoisted input projection (one batched matmul), then recurrence ----
    # xw[m] = x2d[m] @ Wih^T + (b_ih + b_hh),  m = t*bs + b
    xw = jnp.dot(x2d_ref[...], wih_t_ref[...], preferred_element_type=f32) + b_rnn_ref[...]
    whh_t = whh_t_ref[...]                                   # hoisted load

    h = jnp.zeros((bs, hs), f32)
    for t in range(sl):                                      # static unroll (sl known)
        h = jnp.tanh(xw[t * bs:(t + 1) * bs, :]
                     + jnp.dot(h, whh_t, preferred_element_type=f32))
        # Scatter relu(h_t) into torch's row-major (sl,bs,hs)->(bs,sl*hs) layout.
        h_relu = jnp.maximum(h, 0.0)
        for b in range(bs):
            m = t * bs + b
            r, j = divmod(m, sl)
            oflat_sc[r:r + 1, j * hs:(j + 1) * hs] = h_relu[b:b + 1, :]

    # ---- the three MLP heads (rows = batch rows -> lane-dense 256-wide outputs) ----
    def mlp(z, w1, b1, w2, b2):
        hid = jnp.dot(z, w1, preferred_element_type=f32) + b1
        hid = jnp.where(hid > 0, hid, 0.01 * hid)            # LeakyReLU(0.01)
        return jnp.dot(hid, w2, preferred_element_type=f32) + b2

    key_full = mlp(jnp.maximum(h, 0.0),                      # F.relu(h.reshape(bs, hs))
                   kw1_ref[...], kb1_ref[...], kw2_ref[...], kb2_ref[...])   # (bs, sl*hs)
    query_full = mlp(xq_ref[...],                            # X.reshape(bs, sl*ni), no relu
                     qw1_ref[...], qb1_ref[...], qw2_ref[...], qb2_ref[...]) # (bs, sl*hs)
    value_full = mlp(oflat_sc[...],                          # F.relu(o.reshape(bs, sl*hs))
                     vw1_ref[...], vb1_ref[...], vw2_ref[...], vb2_ref[...]) # (bs, sl*hs)

    # ---- unfold (bs, sl*hs) -> per-batch (sl, hs) matrices via scratch scatter ----
    for b in range(bs):
        base = b * sl
        for s in range(sl):
            cols = slice(s * hs, (s + 1) * hs)
            kmat_sc[base + s:base + s + 1, :] = key_full[b:b + 1, cols]
            qmat_sc[base + s:base + s + 1, :] = query_full[b:b + 1, cols]
            vmat_sc[base + s:base + s + 1, :] = value_full[b:b + 1, cols]

    # ---- attention (all batches handled in this single invocation) ----
    for b in range(bs):
        rows = slice(b * sl, (b + 1) * sl)
        k_mat = kmat_sc[rows, :]                             # (sl, hs)
        q_mat = qmat_sc[rows, :]                             # (sl, hs)
        v_mat = vmat_sc[rows, :]                             # (sl, hs)
        # logits = K^T @ Q (contract over sl): transposed-LHS dot on the MXU,
        # no materialized (bs, hs, sl) key transpose anywhere.
        logits = lax.dot_general(k_mat, q_mat, (((0,), (0,)), ((), ())),
                                 preferred_element_type=f32)  # (hs, hs)
        mx = jnp.max(logits, axis=-1, keepdims=True)
        e = jnp.exp(logits - mx)
        p = e * pl.reciprocal(jnp.sum(e, axis=-1, keepdims=True), approx=True)
        attn_ref[b] = p.astype(attn_ref.dtype)

        res = jnp.dot(v_mat, p, preferred_element_type=f32)   # (sl, hs) = V_b @ attn_b
        # Write time-major rows (row = s*bs + b) so the host reshape to
        # (sl, bs, hs) is a free row-major bitcast (no XLA transpose).
        for s in range(sl):
            row = s * bs + b
            atfm2d_ref[row:row + 1, :] = res[s:s + 1, :].astype(atfm2d_ref.dtype)


# ----------------------------------------------------------------------------
# Host wrappers
# ----------------------------------------------------------------------------
def prepare_params(p):
    """One-time weight prep (transposes / bias fusion) — keeps them out of the hot path."""
    return {
        "wih_t": p["w_ih"].T,                                  # (ni, hs)
        "whh_t": p["w_hh"].T,                                  # (hs, hs)
        "b_rnn": (p["b_ih"] + p["b_hh"]).reshape(1, -1),       # (1, hs)
        "kw1t": p["k_w1"].T, "kb1": p["k_b1"].reshape(1, -1),
        "kw2t": p["k_w2"].T, "kb2": p["k_b2"].reshape(1, -1),
        "qw1t": p["q_w1"].T, "qb1": p["q_b1"].reshape(1, -1),
        "qw2t": p["q_w2"].T, "qb2": p["q_b2"].reshape(1, -1),
        "vw1t": p["v_w1"].T, "vb1": p["v_b1"].reshape(1, -1),
        "vw2t": p["v_w2"].T, "vb2": p["v_b2"].reshape(1, -1),
    }


def attention_rnn_forward(x, prep):
    sl, bs, ni = x.shape
    hs = prep["whh_t"].shape[0]

    # Free row-major reshapes of the input (no intermediate HBM traffic).
    x2d = x.reshape(sl * bs, ni)          # row m = t*bs + b  -> x[t, b, :]
    xq = x.reshape(bs, sl * ni)           # torch's X.reshape(xbs, xsl*xhs)

    atfm2d, attnmap = pl.pallas_call(
        fused_attention_rnn_kernel,
        out_shape=(
            jax.ShapeDtypeStruct((sl * bs, hs), x.dtype),      # atfm, time-major rows
            jax.ShapeDtypeStruct((bs, hs, hs), x.dtype),       # attnmap
        ),
        scratch_shapes=[
            pltpu.VMEM((bs, sl * hs), jnp.float32),            # relu(o) in (bs, sl*hs) layout
            pltpu.VMEM((bs * sl, hs), jnp.float32),            # K matrices, batch-major rows
            pltpu.VMEM((bs * sl, hs), jnp.float32),            # Q matrices
            pltpu.VMEM((bs * sl, hs), jnp.float32),            # V matrices
        ],
    )(x2d, xq,
      prep["wih_t"], prep["whh_t"], prep["b_rnn"],
      prep["kw1t"], prep["kb1"], prep["kw2t"], prep["kb2"],
      prep["qw1t"], prep["qb1"], prep["qw2t"], prep["qb2"],
      prep["vw1t"], prep["vb1"], prep["vw2t"], prep["vb2"])

    atfm = atfm2d.reshape(sl, bs, hs)     # free row-major reshape (rows are s*bs + b)
    return atfm, attnmap


# ----------------------------------------------------------------------------
# Pure-JAX reference (mirrors the PyTorch forward) for validation.
# ----------------------------------------------------------------------------
def reference_forward(x, p):
    sl, bs, ni = x.shape
    hs = p["w_hh"].shape[0]
    h = jnp.zeros((bs, hs), jnp.float32)
    outs = []
    for t in range(sl):
        h = jnp.tanh(x[t] @ p["w_ih"].T + p["b_ih"] + h @ p["w_hh"].T + p["b_hh"])
        outs.append(h)
    o = jnp.stack(outs, 0)

    def lrelu(z):
        return jnp.where(z > 0, z, 0.01 * z)

    def mlp(z, w1, b1, w2, b2):
        return lrelu(z @ w1.T + b1) @ w2.T + b2

    key = mlp(jnp.maximum(h.reshape(bs, hs), 0), p["k_w1"], p["k_b1"], p["k_w2"], p["k_b2"])
    query = mlp(x.reshape(bs, sl * ni), p["q_w1"], p["q_b1"], p["q_w2"], p["q_b2"])
    value = mlp(jnp.maximum(o.reshape(bs, sl * hs), 0), p["v_w1"], p["v_b1"], p["v_w2"], p["v_b2"])

    key = key.reshape(bs, sl, hs).transpose(0, 2, 1)
    query = query.reshape(bs, sl, hs)
    value = value.reshape(bs, sl, hs)
    attn = jax.nn.softmax(jnp.einsum("bhs,bsd->bhd", key, query), axis=2)
    atfm = jnp.einsum("bsh,bhd->bsd", value, attn).transpose(1, 0, 2)
    return atfm, attn


# ----------------------------------------------------------------------------
# Deterministic parameter init (same shapes as the torch module's __init__).
# ----------------------------------------------------------------------------
def init_params(rng, ni, hs, sl):
    ks = jax.random.split(rng, 16)

    def u(k, shape, bound):
        return jax.random.uniform(k, shape, jnp.float32, -bound, bound)

    rb = 1.0 / math.sqrt(hs)
    p = {
        "w_ih": u(ks[0], (hs, ni), rb),
        "w_hh": u(ks[1], (hs, hs), rb),
        "b_ih": u(ks[2], (hs,), rb),
        "b_hh": u(ks[3], (hs,), rb),
    }

    def linear(k1, k2, out_f, in_f):
        b = 1.0 / math.sqrt(in_f)
        return u(k1, (out_f, in_f), b), u(k2, (out_f,), b)

    p["k_w1"], p["k_b1"] = linear(ks[4], ks[5], hs, hs)
    p["k_w2"], p["k_b2"] = linear(ks[6], ks[7], hs * sl, hs)
    p["q_w1"], p["q_b1"] = linear(ks[8], ks[9], hs, ni * sl)
    p["q_w2"], p["q_b2"] = linear(ks[10], ks[11], hs * sl, hs)
    p["v_w1"], p["v_b1"] = linear(ks[12], ks[13], hs, hs * sl)
    p["v_w2"], p["v_b2"] = linear(ks[14], ks[15], hs * sl, hs)
    return p


if __name__ == "__main__":
    sl, bs, ni, hs = 8, 2, 4, 32

    root = jax.random.PRNGKey(0)
    k_x, k_p = jax.random.split(root)
    x = jax.random.normal(k_x, (sl, bs, ni), jnp.float32)
    params = init_params(k_p, ni, hs, sl)
    prep = prepare_params(params)     # one-time weight transposes / bias fusion

    fwd = jax.jit(attention_rnn_forward)
    atfm, attnmap = fwd(x, prep)
    jax.block_until_ready((atfm, attnmap))

    atfm_ref, attn_ref = reference_forward(x, params)
    assert atfm.shape == (sl, bs, hs) and attnmap.shape == (bs, hs, hs)
    assert bool(jnp.all(jnp.isfinite(atfm))) and bool(jnp.all(jnp.isfinite(attnmap)))
    # tolerances account for the EUP approximate-reciprocal softmax denominator
    assert jnp.allclose(attnmap, attn_ref, atol=1e-3, rtol=1e-3)
    assert jnp.allclose(atfm, atfm_ref, atol=1e-3, rtol=1e-3)

    print("KERNEL_OK")
</pallas_src>

<mosaic_0001>
module attributes {stable_mosaic.version = 11 : i64} {
  func.func @fused_attention_rnn_kernel(%arg0: memref<16x4xf32, #tpu.memory_space<vmem>>, %arg1: memref<2x32xf32, #tpu.memory_space<vmem>>, %arg2: memref<4x32xf32, #tpu.memory_space<vmem>>, %arg3: memref<32x32xf32, #tpu.memory_space<vmem>>, %arg4: memref<1x32xf32, #tpu.memory_space<vmem>>, %arg5: memref<32x32xf32, #tpu.memory_space<vmem>>, %arg6: memref<1x32xf32, #tpu.memory_space<vmem>>, %arg7: memref<32x256xf32, #tpu.memory_space<vmem>>, %arg8: memref<1x256xf32, #tpu.memory_space<vmem>>, %arg9: memref<32x32xf32, #tpu.memory_space<vmem>>, %arg10: memref<1x32xf32, #tpu.memory_space<vmem>>, %arg11: memref<32x256xf32, #tpu.memory_space<vmem>>, %arg12: memref<1x256xf32, #tpu.memory_space<vmem>>, %arg13: memref<256x32xf32, #tpu.memory_space<vmem>>, %arg14: memref<1x32xf32, #tpu.memory_space<vmem>>, %arg15: memref<32x256xf32, #tpu.memory_space<vmem>>, %arg16: memref<1x256xf32, #tpu.memory_space<vmem>>, %arg17: memref<16x32xf32, #tpu.memory_space<vmem>>, %arg18: memref<2x32x32xf32, #tpu.memory_space<vmem>>, %arg19: memref<2x256xf32, #tpu.memory_space<vmem>>, %arg20: memref<16x32xf32, #tpu.memory_space<vmem>>, %arg21: memref<16x32xf32, #tpu.memory_space<vmem>>, %arg22: memref<16x32xf32, #tpu.memory_space<vmem>>) attributes {dimension_semantics = [], scalar_prefetch = 0 : i64, scratch_operands = 4 : i64, tpu.core_type = #tpu.core_type<tc>} {
    %c0 = arith.constant 0 : index
    %c0_0 = arith.constant 0 : index
    %0 = vector.load %arg0[%c0, %c0_0] : memref<16x4xf32, #tpu.memory_space<vmem>>, vector<16x4xf32>
    %c0_1 = arith.constant 0 : index
    %c0_2 = arith.constant 0 : index
    %1 = vector.load %arg2[%c0_1, %c0_2] : memref<4x32xf32, #tpu.memory_space<vmem>>, vector<4x32xf32>
    %cst = arith.constant dense<0.000000e+00> : vector<16x32xf32>
    %2 = tpu.matmul %0, %1, %cst {dimension_numbers = #tpu.dot_dimension_numbers<[1], [0], [0], [1], [0, 0, 1, 1], [], []>} : vector<16x4xf32>, vector<4x32xf32>, vector<16x32xf32> -> vector<16x32xf32>
    %c0_3 = arith.constant 0 : index
    %c0_4 = arith.constant 0 : index
    %3 = vector.load %arg4[%c0_3, %c0_4] : memref<1x32xf32, #tpu.memory_space<vmem>>, vector<1x32xf32>
    %4 = vector.broadcast %3 : vector<1x32xf32> to vector<16x32xf32>
    %5 = arith.addf %2, %4 : vector<16x32xf32>
    %c0_5 = arith.constant 0 : index
    %c0_6 = arith.constant 0 : index
    %6 = vector.load %arg3[%c0_5, %c0_6] : memref<32x32xf32, #tpu.memory_space<vmem>>, vector<32x32xf32>
    %cst_7 = arith.constant 0.000000e+00 : f32
    %7 = vector.broadcast %cst_7 : f32 to vector<2x32xf32>
    %8 = vector.extract_strided_slice %5 {offsets = [0, 0], sizes = [2, 32], strides = [1, 1]} : vector<16x32xf32> to vector<2x32xf32>
    %cst_8 = arith.constant dense<0.000000e+00> : vector<2x32xf32>
    %9 = tpu.matmul %7, %6, %cst_8 {dimension_numbers = #tpu.dot_dimension_numbers<[1], [0], [0], [1], [0, 0, 1, 1], [], []>} : vector<2x32xf32>, vector<32x32xf32>, vector<2x32xf32> -> vector<2x32xf32>
    %10 = arith.addf %8, %9 : vector<2x32xf32>
    %11 = math.tanh %10 : vector<2x32xf32>
    %cst_9 = arith.constant 0.000000e+00 : f32
    %12 = vector.broadcast %cst_9 : f32 to vector<2x32xf32>
    %13 = arith.maximumf %11, %12 : vector<2x32xf32>
    %14 = vector.extract_strided_slice %13 {offsets = [0, 0], sizes = [1, 32], strides = [1, 1]} : vector<2x32xf32> to vector<1x32xf32>
    %c0_10 = arith.constant 0 : index
    %c0_11 = arith.constant 0 : index
    %15 = vector.load %arg19[%c0_10, %c0_11] : memref<2x256xf32, #tpu.memory_space<vmem>>, vector<1x32xf32>
    tpu.vector_store %arg19[%c0_10, %c0_11], %14 {strides = array<i32>} : memref<2x256xf32, #tpu.memory_space<vmem>>, vector<1x32xf32>,
    %16 = vector.extract_strided_slice %13 {offsets = [1, 0], sizes = [1, 32], strides = [1, 1]} : vector<2x32xf32> to vector<1x32xf32>
    %c0_12 = arith.constant 0 : index
    %c32 = arith.constant 32 : index
    %17 = vector.load %arg19[%c0_12, %c32] : memref<2x256xf32, #tpu.memory_space<vmem>>, vector<1x32xf32>
    tpu.vector_store %arg19[%c0_12, %c32], %16 {strides = array<i32>} : memref<2x256xf32, #tpu.memory_space<vmem>>, vector<1x32xf32>,
    %18 = vector.extract_strided_slice %5 {offsets = [2, 0], sizes = [2, 32], strides = [1, 1]} : vector<16x32xf32> to vector<2x32xf32>
    %cst_13 = arith.constant dense<0.000000e+00> : vector<2x32xf32>
    %19 = tpu.matmul %11, %6, %cst_13 {dimension_numbers = #tpu.dot_dimension_numbers<[1], [0], [0], [1], [0, 0, 1, 1], [], []>} : vector<2x32xf32>, vector<32x32xf32>, vector<2x32xf32> -> vector<2x32xf32>
    %20 = arith.addf %18, %19 : vector<2x32xf32>
    %21 = math.tanh %20 : vector<2x32xf32>
    %cst_14 = arith.constant 0.000000e+00 : f32
    %22 = vector.broadcast %cst_14 : f32 to vector<2x32xf32>
    %23 = arith.maximumf %21, %22 : vector<2x32xf32>
    %24 = vector.extract_strided_slice %23 {offsets = [0, 0], sizes = [1, 32], strides = [1, 1]} : vector<2x32xf32> to vector<1x32xf32>
    %c0_15 = arith.constant 0 : index
    %c64 = arith.constant 64 : index
    %25 = vector.load %arg19[%c0_15, %c64] : memref<2x256xf32, #tpu.memory_space<vmem>>, vector<1x32xf32>
    tpu.vector_store %arg19[%c0_15, %c64], %24 {strides = array<i32>} : memref<2x256xf32, #tpu.memory_space<vmem>>, vector<1x32xf32>,
    %26 = vector.extract_strided_slice %23 {offsets = [1, 0], sizes = [1, 32], strides = [1, 1]} : vector<2x32xf32> to vector<1x32xf32>
    %c0_16 = arith.constant 0 : index
    %c96 = arith.constant 96 : index
    %27 = vector.load %arg19[%c0_16, %c96] : memref<2x256xf32, #tpu.memory_space<vmem>>, vector<1x32xf32>
    tpu.vector_store %arg19[%c0_16, %c96], %26 {strides = array<i32>} : memref<2x256xf32, #tpu.memory_space<vmem>>, vector<1x32xf32>,
    %28 = vector.extract_strided_slice %5 {offsets = [4, 0], sizes = [2, 32], strides = [1, 1]} : vector<16x32xf32> to vector<2x32xf32>
    %cst_17 = arith.constant dense<0.000000e+00> : vector<2x32xf32>
    %29 = tpu.matmul %21, %6, %cst_17 {dimension_numbers = #tpu.dot_dimension_numbers<[1], [0], [0], [1], [0, 0, 1, 1], [], []>} : vector<2x32xf32>, vector<32x32xf32>, vector<2x32xf32> -> vector<2x32xf32>
    %30 = arith.addf %28, %29 : vector<2x32xf32>
    %31 = math.tanh %30 : vector<2x32xf32>
    %cst_18 = arith.constant 0.000000e+00 : f32
    %32 = vector.broadcast %cst_18 : f32 to vector<2x32xf32>
    %33 = arith.maximumf %31, %32 : vector<2x32xf32>
    %34 = vector.extract_strided_slice %33 {offsets = [0, 0], sizes = [1, 32], strides = [1, 1]} : vector<2x32xf32> to vector<1x32xf32>
    %c0_19 = arith.constant 0 : index
    %c128 = arith.constant 128 : index
    %35 = vector.load %arg19[%c0_19, %c128] : memref<2x256xf32, #tpu.memory_space<vmem>>, vector<1x32xf32>
    tpu.vector_store %arg19[%c0_19, %c128], %34 {strides = array<i32>} : memref<2x256xf32, #tpu.memory_space<vmem>>, vector<1x32xf32>,
    %36 = vector.extract_strided_slice %33 {offsets = [1, 0], sizes = [1, 32], strides = [1, 1]} : vector<2x32xf32> to vector<1x32xf32>
    %c0_20 = arith.constant 0 : index
    %c160 = arith.constant 160 : index
    %37 = vector.load %arg19[%c0_20, %c160] : memref<2x256xf32, #tpu.memory_space<vmem>>, vector<1x32xf32>
    tpu.vector_store %arg19[%c0_20, %c160], %36 {strides = array<i32>} : memref<2x256xf32, #tpu.memory_space<vmem>>, vector<1x32xf32>,
    %38 = vector.extract_strided_slice %5 {offsets = [6, 0], sizes = [2, 32], strides = [1, 1]} : vector<16x32xf32> to vector<2x32xf32>
    %cst_21 = arith.constant dense<0.000000e+00> : vector<2x32xf32>
    %39 = tpu.matmul %31, %6, %cst_21 {dimension_numbers = #tpu.dot_dimension_numbers<[1], [0], [0], [1], [0, 0, 1, 1], [], []>} : vector<2x32xf32>, vector<32x32xf32>, vector<2x32xf32> -> vector<2x32xf32>
    %40 = arith.addf %38, %39 : vector<2x32xf32>
    %41 = math.tanh %40 : vector<2x32xf32>
    %cst_22 = arith.constant 0.000000e+00 : f32
    %42 = vector.broadcast %cst_22 : f32 to vector<2x32xf32>
    %43 = arith.maximumf %41, %42 : vector<2x32xf32>
    %44 = vector.extract_strided_slice %43 {offsets = [0, 0], sizes = [1, 32], strides = [1, 1]} : vector<2x32xf32> to vector<1x32xf32>
    %c0_23 = arith.constant 0 : index
    %c192 = arith.constant 192 : index
    %45 = vector.load %arg19[%c0_23, %c192] : memref<2x256xf32, #tpu.memory_space<vmem>>, vector<1x32xf32>
    tpu.vector_store %arg19[%c0_23, %c192], %44 {strides = array<i32>} : memref<2x256xf32, #tpu.memory_space<vmem>>, vector<1x32xf32>,
    %46 = vector.extract_strided_slice %43 {offsets = [1, 0], sizes = [1, 32], strides = [1, 1]} : vector<2x32xf32> to vector<1x32xf32>
    %c0_24 = arith.constant 0 : index
    %c224 = arith.constant 224 : index
    %47 = vector.load %arg19[%c0_24, %c224] : memref<2x256xf32, #tpu.memory_space<vmem>>, vector<1x32xf32>
    tpu.vector_store %arg19[%c0_24, %c224], %46 {strides = array<i32>} : memref<2x256xf32, #tpu.memory_space<vmem>>, vector<1x32xf32>,
    %48 = vector.extract_strided_slice %5 {offsets = [8, 0], sizes = [2, 32], strides = [1, 1]} : vector<16x32xf32> to vector<2x32xf32>
    %cst_25 = arith.constant dense<0.000000e+00> : vector<2x32xf32>
    %49 = tpu.matmul %41, %6, %cst_25 {dimension_numbers = #tpu.dot_dimension_numbers<[1], [0], [0], [1], [0, 0, 1, 1], [], []>} : vector<2x32xf32>, vector<32x32xf32>, vector<2x32xf32> -> vector<2x32xf32>
    %50 = arith.addf %48, %49 : vector<2x32xf32>
    %51 = math.tanh %50 : vector<2x32xf32>
    %cst_26 = arith.constant 0.000000e+00 : f32
    %52 = vector.broadcast %cst_26 : f32 to vector<2x32xf32>
    %53 = arith.maximumf %51, %52 : vector<2x32xf32>
    %54 = vector.extract_strided_slice %53 {offsets = [0, 0], sizes = [1, 32], strides = [1, 1]} : vector<2x32xf32> to vector<1x32xf32>
    %c1 = arith.constant 1 : index
    %c0_27 = arith.constant 0 : index
    %55 = vector.load %arg19[%c1, %c0_27] : memref<2x256xf32, #tpu.memory_space<vmem>>, vector<1x32xf32>
    tpu.vector_store %arg19[%c1, %c0_27], %54 {strides = array<i32>} : memref<2x256xf32, #tpu.memory_space<vmem>>, vector<1x32xf32>,
    %56 = vector.extract_strided_slice %53 {offsets = [1, 0], sizes = [1, 32], strides = [1, 1]} : vector<2x32xf32> to vector<1x32xf32>
    %c1_28 = arith.constant 1 : index
    %c32_29 = arith.constant 32 : index
    %57 = vector.load %arg19[%c1_28, %c32_29] : memref<2x256xf32, #tpu.memory_space<vmem>>, vector<1x32xf32>
    tpu.vector_store %arg19[%c1_28, %c32_29], %56 {strides = array<i32>} : memref<2x256xf32, #tpu.memory_space<vmem>>, vector<1x32xf32>,
    %58 = vector.extract_strided_slice %5 {offsets = [10, 0], sizes = [2, 32], strides = [1, 1]} : vector<16x32xf32> to vector<2x32xf32>
    %cst_30 = arith.constant dense<0.000000e+00> : vector<2x32xf32>
    %59 = tpu.matmul %51, %6, %cst_30 {dimension_numbers = #tpu.dot_dimension_numbers<[1], [0], [0], [1], [0, 0, 1, 1], [], []>} : vector<2x32xf32>, vector<32x32xf32>, vector<2x32xf32> -> vector<2x32xf32>
    %60 = arith.addf %58, %59 : vector<2x32xf32>
    %61 = math.tanh %60 : vector<2x32xf32>
    %cst_31 = arith.constant 0.000000e+00 : f32
    %62 = vector.broadcast %cst_31 : f32 to vector<2x32xf32>
    %63 = arith.maximumf %61, %62 : vector<2x32xf32>
    %64 = vector.extract_strided_slice %63 {offsets = [0, 0], sizes = [1, 32], strides = [1, 1]} : vector<2x32xf32> to vector<1x32xf32>
    %c1_32 = arith.constant 1 : index
    %c64_33 = arith.constant 64 : index
    %65 = vector.load %arg19[%c1_32, %c64_33] : memref<2x256xf32, #tpu.memory_space<vmem>>, vector<1x32xf32>
    tpu.vector_store %arg19[%c1_32, %c64_33], %64 {strides = array<i32>} : memref<2x256xf32, #tpu.memory_space<vmem>>, vector<1x32xf32>,
    %66 = vector.extract_strided_slice %63 {offsets = [1, 0], sizes = [1, 32], strides = [1, 1]} : vector<2x32xf32> to vector<1x32xf32>
    %c1_34 = arith.constant 1 : index
    %c96_35 = arith.constant 96 : index
    %67 = vector.load %arg19[%c1_34, %c96_35] : memref<2x256xf32, #tpu.memory_space<vmem>>, vector<1x32xf32>
    tpu.vector_store %arg19[%c1_34, %c96_35], %66 {strides = array<i32>} : memref<2x256xf32, #tpu.memory_space<vmem>>, vector<1x32xf32>,
    %68 = vector.extract_strided_slice %5 {offsets = [12, 0], sizes = [2, 32], strides = [1, 1]} : vector<16x32xf32> to vector<2x32xf32>
    %cst_36 = arith.constant dense<0.000000e+00> : vector<2x32xf32>
    %69 = tpu.matmul %61, %6, %cst_36 {dimension_numbers = #tpu.dot_dimension_numbers<[1], [0], [0], [1], [0, 0, 1, 1], [], []>} : vector<2x32xf32>, vector<32x32xf32>, vector<2x32xf32> -> vector<2x32xf32>
    %70 = arith.addf %68, %69 : vector<2x32xf32>
    %71 = math.tanh %70 : vector<2x32xf32>
    %cst_37 = arith.constant 0.000000e+00 : f32
    %72 = vector.broadcast %cst_37 : f32 to vector<2x32xf32>
    %73 = arith.maximumf %71, %72 : vector<2x32xf32>
    %74 = vector.extract_strided_slice %73 {offsets = [0, 0], sizes = [1, 32], strides = [1, 1]} : vector<2x32xf32> to vector<1x32xf32>
    %c1_38 = arith.constant 1 : index
    %c128_39 = arith.constant 128 : index
    %75 = vector.load %arg19[%c1_38, %c128_39] : memref<2x256xf32, #tpu.memory_space<vmem>>, vector<1x32xf32>
    tpu.vector_store %arg19[%c1_38, %c128_39], %74 {strides = array<i32>} : memref<2x256xf32, #tpu.memory_space<vmem>>, vector<1x32xf32>,
    %76 = vector.extract_strided_slice %73 {offsets = [1, 0], sizes = [1, 32], strides = [1, 1]} : vector<2x32xf32> to vector<1x32xf32>
    %c1_40 = arith.constant 1 : index
    %c160_41 = arith.constant 160 : index
    %77 = vector.load %arg19[%c1_40, %c160_41] : memref<2x256xf32, #tpu.memory_space<vmem>>, vector<1x32xf32>
    tpu.vector_store %arg19[%c1_40, %c160_41], %76 {strides = array<i32>} : memref<2x256xf32, #tpu.memory_space<vmem>>, vector<1x32xf32>,
    %78 = vector.extract_strided_slice %5 {offsets = [14, 0], sizes = [2, 32], strides = [1, 1]} : vector<16x32xf32> to vector<2x32xf32>
    %cst_42 = arith.constant dense<0.000000e+00> : vector<2x32xf32>
    %79 = tpu.matmul %71, %6, %cst_42 {dimension_numbers = #tpu.dot_dimension_numbers<[1], [0], [0], [1], [0, 0, 1, 1], [], []>} : vector<2x32xf32>, vector<32x32xf32>, vector<2x32xf32> -> vector<2x32xf32>
    %80 = arith.addf %78, %79 : vector<2x32xf32>
    %81 = math.tanh %80 : vector<2x32xf32>
    %cst_43 = arith.constant 0.000000e+00 : f32
    %82 = vector.broadcast %cst_43 : f32 to vector<2x32xf32>
    %83 = arith.maximumf %81, %82 : vector<2x32xf32>
    %84 = vector.extract_strided_slice %83 {offsets = [0, 0], sizes = [1, 32], strides = [1, 1]} : vector<2x32xf32> to vector<1x32xf32>
    %c1_44 = arith.constant 1 : index
    %c192_45 = arith.constant 192 : index
    %85 = vector.load %arg19[%c1_44, %c192_45] : memref<2x256xf32, #tpu.memory_space<vmem>>, vector<1x32xf32>
    tpu.vector_store %arg19[%c1_44, %c192_45], %84 {strides = array<i32>} : memref<2x256xf32, #tpu.memory_space<vmem>>, vector<1x32xf32>,
    %86 = vector.extract_strided_slice %83 {offsets = [1, 0], sizes = [1, 32], strides = [1, 1]} : vector<2x32xf32> to vector<1x32xf32>
    %c1_46 = arith.constant 1 : index
    %c224_47 = arith.constant 224 : index
    %87 = vector.load %arg19[%c1_46, %c224_47] : memref<2x256xf32, #tpu.memory_space<vmem>>, vector<1x32xf32>
    tpu.vector_store %arg19[%c1_46, %c224_47], %86 {strides = array<i32>} : memref<2x256xf32, #tpu.memory_space<vmem>>, vector<1x32xf32>,
    %cst_48 = arith.constant 0.000000e+00 : f32
    %88 = vector.broadcast %cst_48 : f32 to vector<2x32xf32>
    %89 = arith.maximumf %81, %88 : vector<2x32xf32>
    %c0_49 = arith.constant 0 : index
    %c0_50 = arith.constant 0 : index
    %90 = vector.load %arg5[%c0_49, %c0_50] : memref<32x32xf32, #tpu.memory_space<vmem>>, vector<32x32xf32>
    %c0_51 = arith.constant 0 : index
    %c0_52 = arith.constant 0 : index
    %91 = vector.load %arg6[%c0_51, %c0_52] : memref<1x32xf32, #tpu.memory_space<vmem>>, vector<1x32xf32>
    %c0_53 = arith.constant 0 : index
    %c0_54 = arith.constant 0 : index
    %92 = vector.load %arg7[%c0_53, %c0_54] : memref<32x256xf32, #tpu.memory_space<vmem>>, vector<32x256xf32>
    %c0_55 = arith.constant 0 : index
    %c0_56 = arith.constant 0 : index
    %93 = vector.load %arg8[%c0_55, %c0_56] : memref<1x256xf32, #tpu.memory_space<vmem>>, vector<1x256xf32>
    %cst_57 = arith.constant dense<0.000000e+00> : vector<2x32xf32>
    %94 = tpu.matmul %89, %90, %cst_57 {dimension_numbers = #tpu.dot_dimension_numbers<[1], [0], [0], [1], [0, 0, 1, 1], [], []>} : vector<2x32xf32>, vector<32x32xf32>, vector<2x32xf32> -> vector<2x32xf32>
    %95 = vector.broadcast %91 : vector<1x32xf32> to vector<2x32xf32>
    %96 = arith.addf %94, %95 : vector<2x32xf32>
    %cst_58 = arith.constant 0.000000e+00 : f32
    %97 = vector.broadcast %cst_58 : f32 to vector<2x32xf32>
    %98 = arith.cmpf ogt, %96, %97 : vector<2x32xf32>
    %cst_59 = arith.constant 0.00999999977 : f32
    %99 = vector.broadcast %cst_59 : f32 to vector<2x32xf32>
    %100 = arith.mulf %99, %96 : vector<2x32xf32>
    %101 = arith.select %98, %96, %100 : vector<2x32xi1>, vector<2x32xf32>
    %cst_60 = arith.constant dense<0.000000e+00> : vector<2x256xf32>
    %102 = tpu.matmul %101, %92, %cst_60 {dimension_numbers = #tpu.dot_dimension_numbers<[1], [0], [0], [1], [0, 0, 1, 1], [], []>} : vector<2x32xf32>, vector<32x256xf32>, vector<2x256xf32> -> vector<2x256xf32>
    %103 = vector.broadcast %93 : vector<1x256xf32> to vector<2x256xf32>
    %104 = arith.addf %102, %103 : vector<2x256xf32>
    %c0_61 = arith.constant 0 : index
    %c0_62 = arith.constant 0 : index
    %105 = vector.load %arg1[%c0_61, %c0_62] : memref<2x32xf32, #tpu.memory_space<vmem>>, vector<2x32xf32>
    %c0_63 = arith.constant 0 : index
    %c0_64 = arith.constant 0 : index
    %106 = vector.load %arg9[%c0_63, %c0_64] : memref<32x32xf32, #tpu.memory_space<vmem>>, vector<32x32xf32>
    %c0_65 = arith.constant 0 : index
    %c0_66 = arith.constant 0 : index
    %107 = vector.load %arg10[%c0_65, %c0_66] : memref<1x32xf32, #tpu.memory_space<vmem>>, vector<1x32xf32>
    %c0_67 = arith.constant 0 : index
    %c0_68 = arith.constant 0 : index
    %108 = vector.load %arg11[%c0_67, %c0_68] : memref<32x256xf32, #tpu.memory_space<vmem>>, vector<32x256xf32>
    %c0_69 = arith.constant 0 : index
    %c0_70 = arith.constant 0 : index
    %109 = vector.load %arg12[%c0_69, %c0_70] : memref<1x256xf32, #tpu.memory_space<vmem>>, vector<1x256xf32>
    %cst_71 = arith.constant dense<0.000000e+00> : vector<2x32xf32>
    %110 = tpu.matmul %105, %106, %cst_71 {dimension_numbers = #tpu.dot_dimension_numbers<[1], [0], [0], [1], [0, 0, 1, 1], [], []>} : vector<2x32xf32>, vector<32x32xf32>, vector<2x32xf32> -> vector<2x32xf32>
    %111 = vector.broadcast %107 : vector<1x32xf32> to vector<2x32xf32>
    %112 = arith.addf %110, %111 : vector<2x32xf32>
    %cst_72 = arith.constant 0.000000e+00 : f32
    %113 = vector.broadcast %cst_72 : f32 to vector<2x32xf32>
    %114 = arith.cmpf ogt, %112, %113 : vector<2x32xf32>
    %cst_73 = arith.constant 0.00999999977 : f32
    %115 = vector.broadcast %cst_73 : f32 to vector<2x32xf32>
    %116 = arith.mulf %115, %112 : vector<2x32xf32>
    %117 = arith.select %114, %112, %116 : vector<2x32xi1>, vector<2x32xf32>
    %cst_74 = arith.constant dense<0.000000e+00> : vector<2x256xf32>
    %118 = tpu.matmul %117, %108, %cst_74 {dimension_numbers = #tpu.dot_dimension_numbers<[1], [0], [0], [1], [0, 0, 1, 1], [], []>} : vector<2x32xf32>, vector<32x256xf32>, vector<2x256xf32> -> vector<2x256xf32>
    %119 = vector.broadcast %109 : vector<1x256xf32> to vector<2x256xf32>
    %120 = arith.addf %118, %119 : vector<2x256xf32>
    %c0_75 = arith.constant 0 : index
    %c0_76 = arith.constant 0 : index
    %121 = vector.load %arg19[%c0_75, %c0_76] : memref<2x256xf32, #tpu.memory_space<vmem>>, vector<2x256xf32>
    %c0_77 = arith.constant 0 : index
    %c0_78 = arith.constant 0 : index
    %122 = vector.load %arg13[%c0_77, %c0_78] : memref<256x32xf32, #tpu.memory_space<vmem>>, vector<256x32xf32>
    %c0_79 = arith.constant 0 : index
    %c0_80 = arith.constant 0 : index
    %123 = vector.load %arg14[%c0_79, %c0_80] : memref<1x32xf32, #tpu.memory_space<vmem>>, vector<1x32xf32>
    %c0_81 = arith.constant 0 : index
    %c0_82 = arith.constant 0 : index
    %124 = vector.load %arg15[%c0_81, %c0_82] : memref<32x256xf32, #tpu.memory_space<vmem>>, vector<32x256xf32>
    %c0_83 = arith.constant 0 : index
    %c0_84 = arith.constant 0 : index
    %125 = vector.load %arg16[%c0_83, %c0_84] : memref<1x256xf32, #tpu.memory_space<vmem>>, vector<1x256xf32>
    %cst_85 = arith.constant dense<0.000000e+00> : vector<2x32xf32>
    %126 = tpu.matmul %121, %122, %cst_85 {dimension_numbers = #tpu.dot_dimension_numbers<[1], [0], [0], [1], [0, 0, 1, 1], [], []>} : vector<2x256xf32>, vector<256x32xf32>, vector<2x32xf32> -> vector<2x32xf32>
    %127 = vector.broadcast %123 : vector<1x32xf32> to vector<2x32xf32>
    %128 = arith.addf %126, %127 : vector<2x32xf32>
    %cst_86 = arith.constant 0.000000e+00 : f32
    %129 = vector.broadcast %cst_86 : f32 to vector<2x32xf32>
    %130 = arith.cmpf ogt, %128, %129 : vector<2x32xf32>
    %cst_87 = arith.constant 0.00999999977 : f32
    %131 = vector.broadcast %cst_87 : f32 to vector<2x32xf32>
    %132 = arith.mulf %131, %128 : vector<2x32xf32>
    %133 = arith.select %130, %128, %132 : vector<2x32xi1>, vector<2x32xf32>
    %cst_88 = arith.constant dense<0.000000e+00> : vector<2x256xf32>
    %134 = tpu.matmul %133, %124, %cst_88 {dimension_numbers = #tpu.dot_dimension_numbers<[1], [0], [0], [1], [0, 0, 1, 1], [], []>} : vector<2x32xf32>, vector<32x256xf32>, vector<2x256xf32> -> vector<2x256xf32>
    %135 = vector.broadcast %125 : vector<1x256xf32> to vector<2x256xf32>
    %136 = arith.addf %134, %135 : vector<2x256xf32>
    %137 = vector.extract_strided_slice %104 {offsets = [0, 0], sizes = [1, 32], strides = [1, 1]} : vector<2x256xf32> to vector<1x32xf32>
    %c0_89 = arith.constant 0 : index
    %c0_90 = arith.constant 0 : index
    %138 = vector.load %arg20[%c0_89, %c0_90] : memref<16x32xf32, #tpu.memory_space<vmem>>, vector<1x32xf32>
    tpu.vector_store %arg20[%c0_89, %c0_90], %137 {strides = array<i32>} : memref<16x32xf32, #tpu.memory_space<vmem>>, vector<1x32xf32>,
    %139 = vector.extract_strided_slice %120 {offsets = [0, 0], sizes = [1, 32], strides = [1, 1]} : vector<2x256xf32> to vector<1x32xf32>
    %c0_91 = arith.constant 0 : index
    %c0_92 = arith.constant 0 : index
    %140 = vector.load %arg21[%c0_91, %c0_92] : memref<16x32xf32, #tpu.memory_space<vmem>>, vector<1x32xf32>
    tpu.vector_store %arg21[%c0_91, %c0_92], %139 {strides = array<i32>} : memref<16x32xf32, #tpu.memory_space<vmem>>, vector<1x32xf32>,
    %141 = vector.extract_strided_slice %136 {offsets = [0, 0], sizes = [1, 32], strides = [1, 1]} : vector<2x256xf32> to vector<1x32xf32>
    %c0_93 = arith.constant 0 : index
    %c0_94 = arith.constant 0 : index
    %142 = vector.load %arg22[%c0_93, %c0_94] : memref<16x32xf32, #tpu.memory_space<vmem>>, vector<1x32xf32>
    tpu.vector_store %arg22[%c0_93, %c0_94], %141 {strides = array<i32>} : memref<16x32xf32, #tpu.memory_space<vmem>>, vector<1x32xf32>,
    %143 = vector.extract_strided_slice %104 {offsets = [0, 32], sizes = [1, 32], strides = [1, 1]} : vector<2x256xf32> to vector<1x32xf32>
    %c1_95 = arith.constant 1 : index
    %c0_96 = arith.constant 0 : index
    %144 = vector.load %arg20[%c1_95, %c0_96] : memref<16x32xf32, #tpu.memory_space<vmem>>, vector<1x32xf32>
    tpu.vector_store %arg20[%c1_95, %c0_96], %143 {strides = array<i32>} : memref<16x32xf32, #tpu.memory_space<vmem>>, vector<1x32xf32>,
    %145 = vector.extract_strided_slice %120 {offsets = [0, 32], sizes = [1, 32], strides = [1, 1]} : vector<2x256xf32> to vector<1x32xf32>
    %c1_97 = arith.constant 1 : index
    %c0_98 = arith.constant 0 : index
    %146 = vector.load %arg21[%c1_97, %c0_98] : memref<16x32xf32, #tpu.memory_space<vmem>>, vector<1x32xf32>
    tpu.vector_store %arg21[%c1_97, %c0_98], %145 {strides = array<i32>} : memref<16x32xf32, #tpu.memory_space<vmem>>, vector<1x32xf32>,
    %147 = vector.extract_strided_slice %136 {offsets = [0, 32], sizes = [1, 32], strides = [1, 1]} : vector<2x256xf32> to vector<1x32xf32>
    %c1_99 = arith.constant 1 : index
    %c0_100 = arith.constant 0 : index
    %148 = vector.load %arg22[%c1_99, %c0_100] : memref<16x32xf32, #tpu.memory_space<vmem>>, vector<1x32xf32>
    tpu.vector_store %arg22[%c1_99, %c0_100], %147 {strides = array<i32>} : memref<16x32xf32, #tpu.memory_space<vmem>>, vector<1x32xf32>,
    %149 = vector.extract_strided_slice %104 {offsets = [0, 64], sizes = [1, 32], strides = [1, 1]} : vector<2x256xf32> to vector<1x32xf32>
    %c2 = arith.constant 2 : index
    %c0_101 = arith.constant 0 : index
    %150 = vector.load %arg20[%c2, %c0_101] : memref<16x32xf32, #tpu.memory_space<vmem>>, vector<1x32xf32>
    tpu.vector_store %arg20[%c2, %c0_101], %149 {strides = array<i32>} : memref<16x32xf32, #tpu.memory_space<vmem>>, vector<1x32xf32>,
    %151 = vector.extract_strided_slice %120 {offsets = [0, 64], sizes = [1, 32], strides = [1, 1]} : vector<2x256xf32> to vector<1x32xf32>
    %c2_102 = arith.constant 2 : index
    %c0_103 = arith.constant 0 : index
    %152 = vector.load %arg21[%c2_102, %c0_103] : memref<16x32xf32, #tpu.memory_space<vmem>>, vector<1x32xf32>
    tpu.vector_store %arg21[%c2_102, %c0_103], %151 {strides = array<i32>} : memref<16x32xf32, #tpu.memory_space<vmem>>, vector<1x32xf32>,
    %153 = vector.extract_strided_slice %136 {offsets = [0, 64], sizes = [1, 32], strides = [1, 1]} : vector<2x256xf32> to vector<1x32xf32>
    %c2_104 = arith.constant 2 : index
    %c0_105 = arith.constant 0 : index
    %154 = vector.load %arg22[%c2_104, %c0_105] : memref<16x32xf32, #tpu.memory_space<vmem>>, vector<1x32xf32>
    tpu.vector_store %arg22[%c2_104, %c0_105], %153 {strides = array<i32>} : memref<16x32xf32, #tpu.memory_space<vmem>>, vector<1x32xf32>,
    %155 = vector.extract_strided_slice %104 {offsets = [0, 96], sizes = [1, 32], strides = [1, 1]} : vector<2x256xf32> to vector<1x32xf32>
    %c3 = arith.constant 3 : index
    %c0_106 = arith.constant 0 : index
    %156 = vector.load %arg20[%c3, %c0_106] : memref<16x32xf32, #tpu.memory_space<vmem>>, vector<1x32xf32>
    tpu.vector_store %arg20[%c3, %c0_106], %155 {strides = array<i32>} : memref<16x32xf32, #tpu.memory_space<vmem>>, vector<1x32xf32>,
    %157 = vector.extract_strided_slice %120 {offsets = [0, 96], sizes = [1, 32], strides = [1, 1]} : vector<2x256xf32> to vector<1x32xf32>
    %c3_107 = arith.constant 3 : index
    %c0_108 = arith.constant 0 : index
    %158 = vector.load %arg21[%c3_107, %c0_108] : memref<16x32xf32, #tpu.memory_space<vmem>>, vector<1x32xf32>
    tpu.vector_store %arg21[%c3_107, %c0_108], %157 {strides = array<i32>} : memref<16x32xf32, #tpu.memory_space<vmem>>, vector<1x32xf32>,
    %159 = vector.extract_strided_slice %136 {offsets = [0, 96], sizes = [1, 32], strides = [1, 1]} : vector<2x256xf32> to vector<1x32xf32>
    %c3_109 = arith.constant 3 : index
    %c0_110 = arith.constant 0 : index
    %160 = vector.load %arg22[%c3_109, %c0_110] : memref<16x32xf32, #tpu.memory_space<vmem>>, vector<1x32xf32>
    tpu.vector_store %arg22[%c3_109, %c0_110], %159 {strides = array<i32>} : memref<16x32xf32, #tpu.memory_space<vmem>>, vector<1x32xf32>,
    %161 = vector.extract_strided_slice %104 {offsets = [0, 128], sizes = [1, 32], strides = [1, 1]} : vector<2x256xf32> to vector<1x32xf32>
    %c4 = arith.constant 4 : index
    %c0_111 = arith.constant 0 : index
    %162 = vector.load %arg20[%c4, %c0_111] : memref<16x32xf32, #tpu.memory_space<vmem>>, vector<1x32xf32>
    tpu.vector_store %arg20[%c4, %c0_111], %161 {strides = array<i32>} : memref<16x32xf32, #tpu.memory_space<vmem>>, vector<1x32xf32>,
    %163 = vector.extract_strided_slice %120 {offsets = [0, 128], sizes = [1, 32], strides = [1, 1]} : vector<2x256xf32> to vector<1x32xf32>
    %c4_112 = arith.constant 4 : index
    %c0_113 = arith.constant 0 : index
    %164 = vector.load %arg21[%c4_112, %c0_113] : memref<16x32xf32, #tpu.memory_space<vmem>>, vector<1x32xf32>
    tpu.vector_store %arg21[%c4_112, %c0_113], %163 {strides = array<i32>} : memref<16x32xf32, #tpu.memory_space<vmem>>, vector<1x32xf32>,
    %165 = vector.extract_strided_slice %136 {offsets = [0, 128], sizes = [1, 32], strides = [1, 1]} : vector<2x256xf32> to vector<1x32xf32>
    %c4_114 = arith.constant 4 : index
    %c0_115 = arith.constant 0 : index
    %166 = vector.load %arg22[%c4_114, %c0_115] : memref<16x32xf32, #tpu.memory_space<vmem>>, vector<1x32xf32>
    tpu.vector_store %arg22[%c4_114, %c0_115], %165 {strides = array<i32>} : memref<16x32xf32, #tpu.memory_space<vmem>>, vector<1x32xf32>,
    %167 = vector.extract_strided_slice %104 {offsets = [0, 160], sizes = [1, 32], strides = [1, 1]} : vector<2x256xf32> to vector<1x32xf32>
    %c5 = arith.constant 5 : index
    %c0_116 = arith.constant 0 : index
    %168 = vector.load %arg20[%c5, %c0_116] : memref<16x32xf32, #tpu.memory_space<vmem>>, vector<1x32xf32>
    tpu.vector_store %arg20[%c5, %c0_116], %167 {strides = array<i32>} : memref<16x32xf32, #tpu.memory_space<vmem>>, vector<1x32xf32>,
    %169 = vector.extract_strided_slice %120 {offsets = [0, 160], sizes = [1, 32], strides = [1, 1]} : vector<2x256xf32> to vector<1x32xf32>
    %c5_117 = arith.constant 5 : index
    %c0_118 = arith.constant 0 : index
    %170 = vector.load %arg21[%c5_117, %c0_118] : memref<16x32xf32, #tpu.memory_space<vmem>>, vector<1x32xf32>
    tpu.vector_store %arg21[%c5_117, %c0_118], %169 {strides = array<i32>} : memref<16x32xf32, #tpu.memory_space<vmem>>, vector<1x32xf32>,
    %171 = vector.extract_strided_slice %136 {offsets = [0, 160], sizes = [1, 32], strides = [1, 1]} : vector<2x256xf32> to vector<1x32xf32>
    %c5_119 = arith.constant 5 : index
    %c0_120 = arith.constant 0 : index
    %172 = vector.load %arg22[%c5_119, %c0_120] : memref<16x32xf32, #tpu.memory_space<vmem>>, vector<1x32xf32>
    tpu.vector_store %arg22[%c5_119, %c0_120], %171 {strides = array<i32>} : memref<16x32xf32, #tpu.memory_space<vmem>>, vector<1x32xf32>,
    %173 = vector.extract_strided_slice %104 {offsets = [0, 192], sizes = [1, 32], strides = [1, 1]} : vector<2x256xf32> to vector<1x32xf32>
    %c6 = arith.constant 6 : index
    %c0_121 = arith.constant 0 : index
    %174 = vector.load %arg20[%c6, %c0_121] : memref<16x32xf32, #tpu.memory_space<vmem>>, vector<1x32xf32>
    tpu.vector_store %arg20[%c6, %c0_121], %173 {strides = array<i32>} : memref<16x32xf32, #tpu.memory_space<vmem>>, vector<1x32xf32>,
    %175 = vector.extract_strided_slice %120 {offsets = [0, 192], sizes = [1, 32], strides = [1, 1]} : vector<2x256xf32> to vector<1x32xf32>
    %c6_122 = arith.constant 6 : index
    %c0_123 = arith.constant 0 : index
    %176 = vector.load %arg21[%c6_122, %c0_123] : memref<16x32xf32, #tpu.memory_space<vmem>>, vector<1x32xf32>
    tpu.vector_store %arg21[%c6_122, %c0_123], %175 {strides = array<i32>} : memref<16x32xf32, #tpu.memory_space<vmem>>, vector<1x32xf32>,
    %177 = vector.extract_strided_slice %136 {offsets = [0, 192], sizes = [1, 32], strides = [1, 1]} : vector<2x256xf32> to vector<1x32xf32>
    %c6_124 = arith.constant 6 : index
    %c0_125 = arith.constant 0 : index
    %178 = vector.load %arg22[%c6_124, %c0_125] : memref<16x32xf32, #tpu.memory_space<vmem>>, vector<1x32xf32>
    tpu.vector_store %arg22[%c6_124, %c0_125], %177 {strides = array<i32>} : memref<16x32xf32, #tpu.memory_space<vmem>>, vector<1x32xf32>,
    %179 = vector.extract_strided_slice %104 {offsets = [0, 224], sizes = [1, 32], strides = [1, 1]} : vector<2x256xf32> to vector<1x32xf32>
    %c7 = arith.constant 7 : index
    %c0_126 = arith.constant 0 : index
    %180 = vector.load %arg20[%c7, %c0_126] : memref<16x32xf32, #tpu.memory_space<vmem>>, vector<1x32xf32>
    tpu.vector_store %arg20[%c7, %c0_126], %179 {strides = array<i32>} : memref<16x32xf32, #tpu.memory_space<vmem>>, vector<1x32xf32>,
    %181 = vector.extract_strided_slice %120 {offsets = [0, 224], sizes = [1, 32], strides = [1, 1]} : vector<2x256xf32> to vector<1x32xf32>
    %c7_127 = arith.constant 7 : index
    %c0_128 = arith.constant 0 : index
    %182 = vector.load %arg21[%c7_127, %c0_128] : memref<16x32xf32, #tpu.memory_space<vmem>>, vector<1x32xf32>
    tpu.vector_store %arg21[%c7_127, %c0_128], %181 {strides = array<i32>} : memref<16x32xf32, #tpu.memory_space<vmem>>, vector<1x32xf32>,
    %183 = vector.extract_strided_slice %136 {offsets = [0, 224], sizes = [1, 32], strides = [1, 1]} : vector<2x256xf32> to vector<1x32xf32>
    %c7_129 = arith.constant 7 : index
    %c0_130 = arith.constant 0 : index
    %184 = vector.load %arg22[%c7_129, %c0_130] : memref<16x32xf32, #tpu.memory_space<vmem>>, vector<1x32xf32>
    tpu.vector_store %arg22[%c7_129, %c0_130], %183 {strides = array<i32>} : memref<16x32xf32, #tpu.memory_space<vmem>>, vector<1x32xf32>,
    %185 = vector.extract_strided_slice %104 {offsets = [1, 0], sizes = [1, 32], strides = [1, 1]} : vector<2x256xf32> to vector<1x32xf32>
    %c8 = arith.constant 8 : index
    %c0_131 = arith.constant 0 : index
    %186 = vector.load %arg20[%c8, %c0_131] : memref<16x32xf32, #tpu.memory_space<vmem>>, vector<1x32xf32>
    tpu.vector_store %arg20[%c8, %c0_131], %185 {strides = array<i32>} : memref<16x32xf32, #tpu.memory_space<vmem>>, vector<1x32xf32>,
    %187 = vector.extract_strided_slice %120 {offsets = [1, 0], sizes = [1, 32], strides = [1, 1]} : vector<2x256xf32> to vector<1x32xf32>
    %c8_132 = arith.constant 8 : index
    %c0_133 = arith.constant 0 : index
    %188 = vector.load %arg21[%c8_132, %c0_133] : memref<16x32xf32, #tpu.memory_space<vmem>>, vector<1x32xf32>
    tpu.vector_store %arg21[%c8_132, %c0_133], %187 {strides = array<i32>} : memref<16x32xf32, #tpu.memory_space<vmem>>, vector<1x32xf32>,
    %189 = vector.extract_strided_slice %136 {offsets = [1, 0], sizes = [1, 32], strides = [1, 1]} : vector<2x256xf32> to vector<1x32xf32>
    %c8_134 = arith.constant 8 : index
    %c0_135 = arith.constant 0 : index
    %190 = vector.load %arg22[%c8_134, %c0_135] : memref<16x32xf32, #tpu.memory_space<vmem>>, vector<1x32xf32>
    tpu.vector_store %arg22[%c8_134, %c0_135], %189 {strides = array<i32>} : memref<16x32xf32, #tpu.memory_space<vmem>>, vector<1x32xf32>,
    %191 = vector.extract_strided_slice %104 {offsets = [1, 32], sizes = [1, 32], strides = [1, 1]} : vector<2x256xf32> to vector<1x32xf32>
    %c9 = arith.constant 9 : index
    %c0_136 = arith.constant 0 : index
    %192 = vector.load %arg20[%c9, %c0_136] : memref<16x32xf32, #tpu.memory_space<vmem>>, vector<1x32xf32>
    tpu.vector_store %arg20[%c9, %c0_136], %191 {strides = array<i32>} : memref<16x32xf32, #tpu.memory_space<vmem>>, vector<1x32xf32>,
    %193 = vector.extract_strided_slice %120 {offsets = [1, 32], sizes = [1, 32], strides = [1, 1]} : vector<2x256xf32> to vector<1x32xf32>
    %c9_137 = arith.constant 9 : index
    %c0_138 = arith.constant 0 : index
    %194 = vector.load %arg21[%c9_137, %c0_138] : memref<16x32xf32, #tpu.memory_space<vmem>>, vector<1x32xf32>
    tpu.vector_store %arg21[%c9_137, %c0_138], %193 {strides = array<i32>} : memref<16x32xf32, #tpu.memory_space<vmem>>, vector<1x32xf32>,
    %195 = vector.extract_strided_slice %136 {offsets = [1, 32], sizes = [1, 32], strides = [1, 1]} : vector<2x256xf32> to vector<1x32xf32>
    %c9_139 = arith.constant 9 : index
    %c0_140 = arith.constant 0 : index
    %196 = vector.load %arg22[%c9_139, %c0_140] : memref<16x32xf32, #tpu.memory_space<vmem>>, vector<1x32xf32>
    tpu.vector_store %arg22[%c9_139, %c0_140], %195 {strides = array<i32>} : memref<16x32xf32, #tpu.memory_space<vmem>>, vector<1x32xf32>,
    %197 = vector.extract_strided_slice %104 {offsets = [1, 64], sizes = [1, 32], strides = [1, 1]} : vector<2x256xf32> to vector<1x32xf32>
    %c10 = arith.constant 10 : index
    %c0_141 = arith.constant 0 : index
    %198 = vector.load %arg20[%c10, %c0_141] : memref<16x32xf32, #tpu.memory_space<vmem>>, vector<1x32xf32>
    tpu.vector_store %arg20[%c10, %c0_141], %197 {strides = array<i32>} : memref<16x32xf32, #tpu.memory_space<vmem>>, vector<1x32xf32>,
    %199 = vector.extract_strided_slice %120 {offsets = [1, 64], sizes = [1, 32], strides = [1, 1]} : vector<2x256xf32> to vector<1x32xf32>
    %c10_142 = arith.constant 10 : index
    %c0_143 = arith.constant 0 : index
    %200 = vector.load %arg21[%c10_142, %c0_143] : memref<16x32xf32, #tpu.memory_space<vmem>>, vector<1x32xf32>
    tpu.vector_store %arg21[%c10_142, %c0_143], %199 {strides = array<i32>} : memref<16x32xf32, #tpu.memory_space<vmem>>, vector<1x32xf32>,
    %201 = vector.extract_strided_slice %136 {offsets = [1, 64], sizes = [1, 32], strides = [1, 1]} : vector<2x256xf32> to vector<1x32xf32>
    %c10_144 = arith.constant 10 : index
    %c0_145 = arith.constant 0 : index
    %202 = vector.load %arg22[%c10_144, %c0_145] : memref<16x32xf32, #tpu.memory_space<vmem>>, vector<1x32xf32>
    tpu.vector_store %arg22[%c10_144, %c0_145], %201 {strides = array<i32>} : memref<16x32xf32, #tpu.memory_space<vmem>>, vector<1x32xf32>,
    %203 = vector.extract_strided_slice %104 {offsets = [1, 96], sizes = [1, 32], strides = [1, 1]} : vector<2x256xf32> to vector<1x32xf32>
    %c11 = arith.constant 11 : index
    %c0_146 = arith.constant 0 : index
    %204 = vector.load %arg20[%c11, %c0_146] : memref<16x32xf32, #tpu.memory_space<vmem>>, vector<1x32xf32>
    tpu.vector_store %arg20[%c11, %c0_146], %203 {strides = array<i32>} : memref<16x32xf32, #tpu.memory_space<vmem>>, vector<1x32xf32>,
    %205 = vector.extract_strided_slice %120 {offsets = [1, 96], sizes = [1, 32], strides = [1, 1]} : vector<2x256xf32> to vector<1x32xf32>
    %c11_147 = arith.constant 11 : index
    %c0_148 = arith.constant 0 : index
    %206 = vector.load %arg21[%c11_147, %c0_148] : memref<16x32xf32, #tpu.memory_space<vmem>>, vector<1x32xf32>
    tpu.vector_store %arg21[%c11_147, %c0_148], %205 {strides = array<i32>} : memref<16x32xf32, #tpu.memory_space<vmem>>, vector<1x32xf32>,
    %207 = vector.extract_strided_slice %136 {offsets = [1, 96], sizes = [1, 32], strides = [1, 1]} : vector<2x256xf32> to vector<1x32xf32>
    %c11_149 = arith.constant 11 : index
    %c0_150 = arith.constant 0 : index
    %208 = vector.load %arg22[%c11_149, %c0_150] : memref<16x32xf32, #tpu.memory_space<vmem>>, vector<1x32xf32>
    tpu.vector_store %arg22[%c11_149, %c0_150], %207 {strides = array<i32>} : memref<16x32xf32, #tpu.memory_space<vmem>>, vector<1x32xf32>,
    %209 = vector.extract_strided_slice %104 {offsets = [1, 128], sizes = [1, 32], strides = [1, 1]} : vector<2x256xf32> to vector<1x32xf32>
    %c12 = arith.constant 12 : index
    %c0_151 = arith.constant 0 : index
    %210 = vector.load %arg20[%c12, %c0_151] : memref<16x32xf32, #tpu.memory_space<vmem>>, vector<1x32xf32>
    tpu.vector_store %arg20[%c12, %c0_151], %209 {strides = array<i32>} : memref<16x32xf32, #tpu.memory_space<vmem>>, vector<1x32xf32>,
    %211 = vector.extract_strided_slice %120 {offsets = [1, 128], sizes = [1, 32], strides = [1, 1]} : vector<2x256xf32> to vector<1x32xf32>
    %c12_152 = arith.constant 12 : index
    %c0_153 = arith.constant 0 : index
    %212 = vector.load %arg21[%c12_152, %c0_153] : memref<16x32xf32, #tpu.memory_space<vmem>>, vector<1x32xf32>
    tpu.vector_store %arg21[%c12_152, %c0_153], %211 {strides = array<i32>} : memref<16x32xf32, #tpu.memory_space<vmem>>, vector<1x32xf32>,
    %213 = vector.extract_strided_slice %136 {offsets = [1, 128], sizes = [1, 32], strides = [1, 1]} : vector<2x256xf32> to vector<1x32xf32>
    %c12_154 = arith.constant 12 : index
    %c0_155 = arith.constant 0 : index
    %214 = vector.load %arg22[%c12_154, %c0_155] : memref<16x32xf32, #tpu.memory_space<vmem>>, vector<1x32xf32>
    tpu.vector_store %arg22[%c12_154, %c0_155], %213 {strides = array<i32>} : memref<16x32xf32, #tpu.memory_space<vmem>>, vector<1x32xf32>,
    %215 = vector.extract_strided_slice %104 {offsets = [1, 160], sizes = [1, 32], strides = [1, 1]} : vector<2x256xf32> to vector<1x32xf32>
    %c13 = arith.constant 13 : index
    %c0_156 = arith.constant 0 : index
    %216 = vector.load %arg20[%c13, %c0_156] : memref<16x32xf32, #tpu.memory_space<vmem>>, vector<1x32xf32>
    tpu.vector_store %arg20[%c13, %c0_156], %215 {strides = array<i32>} : memref<16x32xf32, #tpu.memory_space<vmem>>, vector<1x32xf32>,
    %217 = vector.extract_strided_slice %120 {offsets = [1, 160], sizes = [1, 32], strides = [1, 1]} : vector<2x256xf32> to vector<1x32xf32>
    %c13_157 = arith.constant 13 : index
    %c0_158 = arith.constant 0 : index
    %218 = vector.load %arg21[%c13_157, %c0_158] : memref<16x32xf32, #tpu.memory_space<vmem>>, vector<1x32xf32>
    tpu.vector_store %arg21[%c13_157, %c0_158], %217 {strides = array<i32>} : memref<16x32xf32, #tpu.memory_space<vmem>>, vector<1x32xf32>,
    %219 = vector.extract_strided_slice %136 {offsets = [1, 160], sizes = [1, 32], strides = [1, 1]} : vector<2x256xf32> to vector<1x32xf32>
    %c13_159 = arith.constant 13 : index
    %c0_160 = arith.constant 0 : index
    %220 = vector.load %arg22[%c13_159, %c0_160] : memref<16x32xf32, #tpu.memory_space<vmem>>, vector<1x32xf32>
    tpu.vector_store %arg22[%c13_159, %c0_160], %219 {strides = array<i32>} : memref<16x32xf32, #tpu.memory_space<vmem>>, vector<1x32xf32>,
    %221 = vector.extract_strided_slice %104 {offsets = [1, 192], sizes = [1, 32], strides = [1, 1]} : vector<2x256xf32> to vector<1x32xf32>
    %c14 = arith.constant 14 : index
    %c0_161 = arith.constant 0 : index
    %222 = vector.load %arg20[%c14, %c0_161] : memref<16x32xf32, #tpu.memory_space<vmem>>, vector<1x32xf32>
    tpu.vector_store %arg20[%c14, %c0_161], %221 {strides = array<i32>} : memref<16x32xf32, #tpu.memory_space<vmem>>, vector<1x32xf32>,
    %223 = vector.extract_strided_slice %120 {offsets = [1, 192], sizes = [1, 32], strides = [1, 1]} : vector<2x256xf32> to vector<1x32xf32>
    %c14_162 = arith.constant 14 : index
    %c0_163 = arith.constant 0 : index
    %224 = vector.load %arg21[%c14_162, %c0_163] : memref<16x32xf32, #tpu.memory_space<vmem>>, vector<1x32xf32>
    tpu.vector_store %arg21[%c14_162, %c0_163], %223 {strides = array<i32>} : memref<16x32xf32, #tpu.memory_space<vmem>>, vector<1x32xf32>,
    %225 = vector.extract_strided_slice %136 {offsets = [1, 192], sizes = [1, 32], strides = [1, 1]} : vector<2x256xf32> to vector<1x32xf32>
    %c14_164 = arith.constant 14 : index
    %c0_165 = arith.constant 0 : index
    %226 = vector.load %arg22[%c14_164, %c0_165] : memref<16x32xf32, #tpu.memory_space<vmem>>, vector<1x32xf32>
    tpu.vector_store %arg22[%c14_164, %c0_165], %225 {strides = array<i32>} : memref<16x32xf32, #tpu.memory_space<vmem>>, vector<1x32xf32>,
    %227 = vector.extract_strided_slice %104 {offsets = [1, 224], sizes = [1, 32], strides = [1, 1]} : vector<2x256xf32> to vector<1x32xf32>
    %c15 = arith.constant 15 : index
    %c0_166 = arith.constant 0 : index
    %228 = vector.load %arg20[%c15, %c0_166] : memref<16x32xf32, #tpu.memory_space<vmem>>, vector<1x32xf32>
    tpu.vector_store %arg20[%c15, %c0_166], %227 {strides = array<i32>} : memref<16x32xf32, #tpu.memory_space<vmem>>, vector<1x32xf32>,
    %229 = vector.extract_strided_slice %120 {offsets = [1, 224], sizes = [1, 32], strides = [1, 1]} : vector<2x256xf32> to vector<1x32xf32>
    %c15_167 = arith.constant 15 : index
    %c0_168 = arith.constant 0 : index
    %230 = vector.load %arg21[%c15_167, %c0_168] : memref<16x32xf32, #tpu.memory_space<vmem>>, vector<1x32xf32>
    tpu.vector_store %arg21[%c15_167, %c0_168], %229 {strides = array<i32>} : memref<16x32xf32, #tpu.memory_space<vmem>>, vector<1x32xf32>,
    %231 = vector.extract_strided_slice %136 {offsets = [1, 224], sizes = [1, 32], strides = [1, 1]} : vector<2x256xf32> to vector<1x32xf32>
    %c15_169 = arith.constant 15 : index
    %c0_170 = arith.constant 0 : index
    %232 = vector.load %arg22[%c15_169, %c0_170] : memref<16x32xf32, #tpu.memory_space<vmem>>, vector<1x32xf32>
    tpu.vector_store %arg22[%c15_169, %c0_170], %231 {strides = array<i32>} : memref<16x32xf32, #tpu.memory_space<vmem>>, vector<1x32xf32>,
    %c0_171 = arith.constant 0 : index
    %c0_172 = arith.constant 0 : index
    %233 = vector.load %arg20[%c0_171, %c0_172] : memref<16x32xf32, #tpu.memory_space<vmem>>, vector<8x32xf32>
    %c0_173 = arith.constant 0 : index
    %c0_174 = arith.constant 0 : index
    %234 = vector.load %arg21[%c0_173, %c0_174] : memref<16x32xf32, #tpu.memory_space<vmem>>, vector<8x32xf32>
    %c0_175 = arith.constant 0 : index
    %c0_176 = arith.constant 0 : index
    %235 = vector.load %arg22[%c0_175, %c0_176] : memref<16x32xf32, #tpu.memory_space<vmem>>, vector<8x32xf32>
    %cst_177 = arith.constant dense<0.000000e+00> : vector<32x32xf32>
    %236 = tpu.matmul %233, %234, %cst_177 {dimension_numbers = #tpu.dot_dimension_numbers<[0], [0], [1], [1], [0, 1, 1, 1], [], []>} : vector<8x32xf32>, vector<8x32xf32>, vector<32x32xf32> -> vector<32x32xf32>
    %cst_178 = arith.constant dense<0xFF800000> : vector<32xf32>
    %237 = vector.multi_reduction <maximumf>, %236, %cst_178 [1] : vector<32x32xf32> to vector<32xf32>
    %238 = vector.shape_cast %237 : vector<32xf32> to vector<32x1xf32>
    %239 = vector.broadcast %238 : vector<32x1xf32> to vector<32x32xf32>
    %240 = arith.subf %236, %239 : vector<32x32xf32>
    %241 = math.exp %240 : vector<32x32xf32>
    %cst_179 = arith.constant dense<0.000000e+00> : vector<32xf32>
    %242 = vector.multi_reduction <add>, %241, %cst_179 [1] : vector<32x32xf32> to vector<32xf32>
    %243 = vector.shape_cast %242 : vector<32xf32> to vector<32x1xf32>
    %244 = tpu.reciprocal %243 {approx = true} : vector<32x1xf32> -> vector<32x1xf32>
    %245 = vector.broadcast %244 : vector<32x1xf32> to vector<32x32xf32>
    %246 = arith.mulf %241, %245 : vector<32x32xf32>
    %c0_180 = arith.constant 0 : index
    %c0_181 = arith.constant 0 : index
    %c0_182 = arith.constant 0 : index
    %247 = vector.load %arg18[%c0_180, %c0_181, %c0_182] : memref<2x32x32xf32, #tpu.memory_space<vmem>>, vector<1x32x32xf32>
    %248 = vector.shape_cast %247 : vector<1x32x32xf32> to vector<32x32xf32>
    %249 = vector.shape_cast %246 : vector<32x32xf32> to vector<1x32x32xf32>
    tpu.vector_store %arg18[%c0_180, %c0_181, %c0_182], %249 {strides = array<i32>} : memref<2x32x32xf32, #tpu.memory_space<vmem>>, vector<1x32x32xf32>,
    %cst_183 = arith.constant dense<0.000000e+00> : vector<8x32xf32>
    %250 = tpu.matmul %235, %246, %cst_183 {dimension_numbers = #tpu.dot_dimension_numbers<[1], [0], [0], [1], [0, 0, 1, 1], [], []>} : vector<8x32xf32>, vector<32x32xf32>, vector<8x32xf32> -> vector<8x32xf32>
    %251 = vector.extract_strided_slice %250 {offsets = [0, 0], sizes = [1, 32], strides = [1, 1]} : vector<8x32xf32> to vector<1x32xf32>
    %c0_184 = arith.constant 0 : index
    %c0_185 = arith.constant 0 : index
    %252 = vector.load %arg17[%c0_184, %c0_185] : memref<16x32xf32, #tpu.memory_space<vmem>>, vector<1x32xf32>
    tpu.vector_store %arg17[%c0_184, %c0_185], %251 {strides = array<i32>} : memref<16x32xf32, #tpu.memory_space<vmem>>, vector<1x32xf32>,
    %253 = vector.extract_strided_slice %250 {offsets = [1, 0], sizes = [1, 32], strides = [1, 1]} : vector<8x32xf32> to vector<1x32xf32>
    %c2_186 = arith.constant 2 : index
    %c0_187 = arith.constant 0 : index
    %254 = vector.load %arg17[%c2_186, %c0_187] : memref<16x32xf32, #tpu.memory_space<vmem>>, vector<1x32xf32>
    tpu.vector_store %arg17[%c2_186, %c0_187], %253 {strides = array<i32>} : memref<16x32xf32, #tpu.memory_space<vmem>>, vector<1x32xf32>,
    %255 = vector.extract_strided_slice %250 {offsets = [2, 0], sizes = [1, 32], strides = [1, 1]} : vector<8x32xf32> to vector<1x32xf32>
    %c4_188 = arith.constant 4 : index
    %c0_189 = arith.constant 0 : index
    %256 = vector.load %arg17[%c4_188, %c0_189] : memref<16x32xf32, #tpu.memory_space<vmem>>, vector<1x32xf32>
    tpu.vector_store %arg17[%c4_188, %c0_189], %255 {strides = array<i32>} : memref<16x32xf32, #tpu.memory_space<vmem>>, vector<1x32xf32>,
    %257 = vector.extract_strided_slice %250 {offsets = [3, 0], sizes = [1, 32], strides = [1, 1]} : vector<8x32xf32> to vector<1x32xf32>
    %c6_190 = arith.constant 6 : index
    %c0_191 = arith.constant 0 : index
    %258 = vector.load %arg17[%c6_190, %c0_191] : memref<16x32xf32, #tpu.memory_space<vmem>>, vector<1x32xf32>
    tpu.vector_store %arg17[%c6_190, %c0_191], %257 {strides = array<i32>} : memref<16x32xf32, #tpu.memory_space<vmem>>, vector<1x32xf32>,
    %259 = vector.extract_strided_slice %250 {offsets = [4, 0], sizes = [1, 32], strides = [1, 1]} : vector<8x32xf32> to vector<1x32xf32>
    %c8_192 = arith.constant 8 : index
    %c0_193 = arith.constant 0 : index
    %260 = vector.load %arg17[%c8_192, %c0_193] : memref<16x32xf32, #tpu.memory_space<vmem>>, vector<1x32xf32>
    tpu.vector_store %arg17[%c8_192, %c0_193], %259 {strides = array<i32>} : memref<16x32xf32, #tpu.memory_space<vmem>>, vector<1x32xf32>,
    %261 = vector.extract_strided_slice %250 {offsets = [5, 0], sizes = [1, 32], strides = [1, 1]} : vector<8x32xf32> to vector<1x32xf32>
    %c10_194 = arith.constant 10 : index
    %c0_195 = arith.constant 0 : index
    %262 = vector.load %arg17[%c10_194, %c0_195] : memref<16x32xf32, #tpu.memory_space<vmem>>, vector<1x32xf32>
    tpu.vector_store %arg17[%c10_194, %c0_195], %261 {strides = array<i32>} : memref<16x32xf32, #tpu.memory_space<vmem>>, vector<1x32xf32>,
    %263 = vector.extract_strided_slice %250 {offsets = [6, 0], sizes = [1, 32], strides = [1, 1]} : vector<8x32xf32> to vector<1x32xf32>
    %c12_196 = arith.constant 12 : index
    %c0_197 = arith.constant 0 : index
    %264 = vector.load %arg17[%c12_196, %c0_197] : memref<16x32xf32, #tpu.memory_space<vmem>>, vector<1x32xf32>
    tpu.vector_store %arg17[%c12_196, %c0_197], %263 {strides = array<i32>} : memref<16x32xf32, #tpu.memory_space<vmem>>, vector<1x32xf32>,
    %265 = vector.extract_strided_slice %250 {offsets = [7, 0], sizes = [1, 32], strides = [1, 1]} : vector<8x32xf32> to vector<1x32xf32>
    %c14_198 = arith.constant 14 : index
    %c0_199 = arith.constant 0 : index
    %266 = vector.load %arg17[%c14_198, %c0_199] : memref<16x32xf32, #tpu.memory_space<vmem>>, vector<1x32xf32>
    tpu.vector_store %arg17[%c14_198, %c0_199], %265 {strides = array<i32>} : memref<16x32xf32, #tpu.memory_space<vmem>>, vector<1x32xf32>,
    %c8_200 = arith.constant 8 : index
    %c0_201 = arith.constant 0 : index
    %267 = vector.load %arg20[%c8_200, %c0_201] : memref<16x32xf32, #tpu.memory_space<vmem>>, vector<8x32xf32>
    %c8_202 = arith.constant 8 : index
    %c0_203 = arith.constant 0 : index
    %268 = vector.load %arg21[%c8_202, %c0_203] : memref<16x32xf32, #tpu.memory_space<vmem>>, vector<8x32xf32>
    %c8_204 = arith.constant 8 : index
    %c0_205 = arith.constant 0 : index
    %269 = vector.load %arg22[%c8_204, %c0_205] : memref<16x32xf32, #tpu.memory_space<vmem>>, vector<8x32xf32>
    %cst_206 = arith.constant dense<0.000000e+00> : vector<32x32xf32>
    %270 = tpu.matmul %267, %268, %cst_206 {dimension_numbers = #tpu.dot_dimension_numbers<[0], [0], [1], [1], [0, 1, 1, 1], [], []>} : vector<8x32xf32>, vector<8x32xf32>, vector<32x32xf32> -> vector<32x32xf32>
    %cst_207 = arith.constant dense<0xFF800000> : vector<32xf32>
    %271 = vector.multi_reduction <maximumf>, %270, %cst_207 [1] : vector<32x32xf32> to vector<32xf32>
    %272 = vector.shape_cast %271 : vector<32xf32> to vector<32x1xf32>
    %273 = vector.broadcast %272 : vector<32x1xf32> to vector<32x32xf32>
    %274 = arith.subf %270, %273 : vector<32x32xf32>
    %275 = math.exp %274 : vector<32x32xf32>
    %cst_208 = arith.constant dense<0.000000e+00> : vector<32xf32>
    %276 = vector.multi_reduction <add>, %275, %cst_208 [1] : vector<32x32xf32> to vector<32xf32>
    %277 = vector.shape_cast %276 : vector<32xf32> to vector<32x1xf32>
    %278 = tpu.reciprocal %277 {approx = true} : vector<32x1xf32> -> vector<32x1xf32>
    %279 = vector.broadcast %278 : vector<32x1xf32> to vector<32x32xf32>
    %280 = arith.mulf %275, %279 : vector<32x32xf32>
    %c1_209 = arith.constant 1 : index
    %c0_210 = arith.constant 0 : index
    %c0_211 = arith.constant 0 : index
    %281 = vector.load %arg18[%c1_209, %c0_210, %c0_211] : memref<2x32x32xf32, #tpu.memory_space<vmem>>, vector<1x32x32xf32>
    %282 = vector.shape_cast %281 : vector<1x32x32xf32> to vector<32x32xf32>
    %283 = vector.shape_cast %280 : vector<32x32xf32> to vector<1x32x32xf32>
    tpu.vector_store %arg18[%c1_209, %c0_210, %c0_211], %283 {strides = array<i32>} : memref<2x32x32xf32, #tpu.memory_space<vmem>>, vector<1x32x32xf32>,
    %cst_212 = arith.constant dense<0.000000e+00> : vector<8x32xf32>
    %284 = tpu.matmul %269, %280, %cst_212 {dimension_numbers = #tpu.dot_dimension_numbers<[1], [0], [0], [1], [0, 0, 1, 1], [], []>} : vector<8x32xf32>, vector<32x32xf32>, vector<8x32xf32> -> vector<8x32xf32>
    %285 = vector.extract_strided_slice %284 {offsets = [0, 0], sizes = [1, 32], strides = [1, 1]} : vector<8x32xf32> to vector<1x32xf32>
    %c1_213 = arith.constant 1 : index
    %c0_214 = arith.constant 0 : index
    %286 = vector.load %arg17[%c1_213, %c0_214] : memref<16x32xf32, #tpu.memory_space<vmem>>, vector<1x32xf32>
    tpu.vector_store %arg17[%c1_213, %c0_214], %285 {strides = array<i32>} : memref<16x32xf32, #tpu.memory_space<vmem>>, vector<1x32xf32>,
    %287 = vector.extract_strided_slice %284 {offsets = [1, 0], sizes = [1, 32], strides = [1, 1]} : vector<8x32xf32> to vector<1x32xf32>
    %c3_215 = arith.constant 3 : index
    %c0_216 = arith.constant 0 : index
    %288 = vector.load %arg17[%c3_215, %c0_216] : memref<16x32xf32, #tpu.memory_space<vmem>>, vector<1x32xf32>
    tpu.vector_store %arg17[%c3_215, %c0_216], %287 {strides = array<i32>} : memref<16x32xf32, #tpu.memory_space<vmem>>, vector<1x32xf32>,
    %289 = vector.extract_strided_slice %284 {offsets = [2, 0], sizes = [1, 32], strides = [1, 1]} : vector<8x32xf32> to vector<1x32xf32>
    %c5_217 = arith.constant 5 : index
    %c0_218 = arith.constant 0 : index
    %290 = vector.load %arg17[%c5_217, %c0_218] : memref<16x32xf32, #tpu.memory_space<vmem>>, vector<1x32xf32>
    tpu.vector_store %arg17[%c5_217, %c0_218], %289 {strides = array<i32>} : memref<16x32xf32, #tpu.memory_space<vmem>>, vector<1x32xf32>,
    %291 = vector.extract_strided_slice %284 {offsets = [3, 0], sizes = [1, 32], strides = [1, 1]} : vector<8x32xf32> to vector<1x32xf32>
    %c7_219 = arith.constant 7 : index
    %c0_220 = arith.constant 0 : index
    %292 = vector.load %arg17[%c7_219, %c0_220] : memref<16x32xf32, #tpu.memory_space<vmem>>, vector<1x32xf32>
    tpu.vector_store %arg17[%c7_219, %c0_220], %291 {strides = array<i32>} : memref<16x32xf32, #tpu.memory_space<vmem>>, vector<1x32xf32>,
    %293 = vector.extract_strided_slice %284 {offsets = [4, 0], sizes = [1, 32], strides = [1, 1]} : vector<8x32xf32> to vector<1x32xf32>
    %c9_221 = arith.constant 9 : index
    %c0_222 = arith.constant 0 : index
    %294 = vector.load %arg17[%c9_221, %c0_222] : memref<16x32xf32, #tpu.memory_space<vmem>>, vector<1x32xf32>
    tpu.vector_store %arg17[%c9_221, %c0_222], %293 {strides = array<i32>} : memref<16x32xf32, #tpu.memory_space<vmem>>, vector<1x32xf32>,
    %295 = vector.extract_strided_slice %284 {offsets = [5, 0], sizes = [1, 32], strides = [1, 1]} : vector<8x32xf32> to vector<1x32xf32>
    %c11_223 = arith.constant 11 : index
    %c0_224 = arith.constant 0 : index
    %296 = vector.load %arg17[%c11_223, %c0_224] : memref<16x32xf32, #tpu.memory_space<vmem>>, vector<1x32xf32>
    tpu.vector_store %arg17[%c11_223, %c0_224], %295 {strides = array<i32>} : memref<16x32xf32, #tpu.memory_space<vmem>>, vector<1x32xf32>,
    %297 = vector.extract_strided_slice %284 {offsets = [6, 0], sizes = [1, 32], strides = [1, 1]} : vector<8x32xf32> to vector<1x32xf32>
    %c13_225 = arith.constant 13 : index
    %c0_226 = arith.constant 0 : index
    %298 = vector.load %arg17[%c13_225, %c0_226] : memref<16x32xf32, #tpu.memory_space<vmem>>, vector<1x32xf32>
    tpu.vector_store %arg17[%c13_225, %c0_226], %297 {strides = array<i32>} : memref<16x32xf32, #tpu.memory_space<vmem>>, vector<1x32xf32>,
    %299 = vector.extract_strided_slice %284 {offsets = [7, 0], sizes = [1, 32], strides = [1, 1]} : vector<8x32xf32> to vector<1x32xf32>
    %c15_227 = arith.constant 15 : index
    %c0_228 = arith.constant 0 : index
    %300 = vector.load %arg17[%c15_227, %c0_228] : memref<16x32xf32, #tpu.memory_space<vmem>>, vector<1x32xf32>
    tpu.vector_store %arg17[%c15_227, %c0_228], %299 {strides = array<i32>} : memref<16x32xf32, #tpu.memory_space<vmem>>, vector<1x32xf32>,
    return
  }
}

</mosaic_0001>

<bundles_post_ra>
// kernel: attention_rnn_forward.1
= control target key start
LH: loop header
LB: loop body
LE: loop exit
PB: predicated region body
PF: predicated region fallthrough
CT: control target
= control target key end

     0   :  { %s3369_s0 = inlined_call_operand.vmem [shape: f32[16,4], index: 0, kind: input, shape index: {}]   ;;  %s3370_s1 = inlined_call_operand.vmem [shape: f32[2,32], index: 1, kind: input, shape index: {}]   ;;  %s3371_s2 = inlined_call_operand.vmem [shape: f32[4,32], index: 2, kind: input, shape index: {}]   ;;  %s3372_s3 = inlined_call_operand.vmem [shape: f32[32,32], index: 3, kind: input, shape index: {}]   ;;  %s3373_s4 = inlined_call_operand.vmem [shape: f32[1,32], index: 4, kind: input, shape index: {}]   ;;  %s3374_s5 = inlined_call_operand.vmem [shape: f32[32,32], index: 5, kind: input, shape index: {}]   ;;  %s3375_s6 = inlined_call_operand.vmem [shape: f32[1,32], index: 6, kind: input, shape index: {}]   ;;  %s3376_s7 = inlined_call_operand.vmem [shape: f32[32,256], index: 7, kind: input, shape index: {}]   ;;  %s3377_s8 = inlined_call_operand.vmem [shape: f32[1,256], index: 8, kind: input, shape index: {}]   ;;  %s3378_s9 = inlined_call_operand.vmem [shape: f32[32,32], index: 9, kind: input, shape index: {}]   ;;  %s3379_s10 = inlined_call_operand.vmem [shape: f32[1,32], index: 10, kind: input, shape index: {}]   ;;  %s3380_s11 = inlined_call_operand.vmem [shape: f32[32,256], index: 11, kind: input, shape index: {}]   ;;  %s3381_s12 = inlined_call_operand.vmem [shape: f32[1,256], index: 12, kind: input, shape index: {}]   ;;  %s3382_s13 = inlined_call_operand.vmem [shape: f32[256,32], index: 13, kind: input, shape index: {}]   ;;  %s3383_s14 = inlined_call_operand.vmem [shape: f32[1,32], index: 14, kind: input, shape index: {}]   ;;  %s3384_s15 = inlined_call_operand.vmem [shape: f32[32,256], index: 15, kind: input, shape index: {}]   ;;  %s3385_s16 = inlined_call_operand.vmem [shape: f32[1,256], index: 16, kind: input, shape index: {}]   ;;  %s3386_s17 = inlined_call_operand.hbm [shape: f32[16,32], index: 17, kind: output, shape index: {0}]   ;;  %s3387_s18 = inlined_call_operand.hbm [shape: f32[2,32,32], index: 18, kind: output, shape index: {1}]  }
   0x1   :  { %3389 = sst [smem:[#allocation12_spill]] %s3369_s0 }
   0x2   :  { %3390 = sst [smem:[#allocation13_spill]] %s3370_s1 }
   0x3   :  { %3391 = sst [smem:[#allocation14_spill]] %s3371_s2 }
   0x4   :  { %24 = vsyncpa [#allocation7], 0  ;;  %v156_v0 = vld [vmem:[%s3372_s3] sm:$0xff]  ;;  %v157_v1 = vld [vmem:[%s3372_s3 + $0x8] sm:$0xff]  ;;  %s3392_s1 = sld [smem:[#allocation14_spill]]  ;;  %vm77_vm0 = vcmask 1043456  }
   0x5   :  { %v2724_v3 = vmov 0.0|0.0   ;;  %v2840_v4 = vpack.c.bf16 %v157_v1, %v156_v0  ;;  %s3393_s22 = sld [smem:[#allocation12_spill]]  ;;  %vm70_vm1 = vcmask 31744   ;;  %v158_v7 = vld [vmem:[%s3372_s3 + $0x10] sm:$0xff]  ;;  %v159_v8 = vld [vmem:[%s3372_s3 + $0x18] sm:$0xff] }
   0x6   :  { %2489 = vmatprep.subr.bf16.mxu1 %v2724_v3 }
   0xa   :  { %v62_v2 = vld [vmem:[%s3392_s1] sm:$0xf] }
   0xb   :  { %2336 = vmatprep.subr.msk.mxu0 %vm77_vm0, %v62_v2  ;;  %v60_v5 = vld [vmem:[%s3393_s22] sm:$0xff]  ;;  %v61_v6 = vld [vmem:[%s3393_s22 + $0x8] sm:$0xff] }
   0xc   :  { %2337 = vmatpush3.msk.msra.mxu0 %vm77_vm0, %v62_v2  ;;  %2338 = vmatprep.mubr.msk.f32.mxu0 %vm70_vm1, %v60_v5 }
   0xd   :  { %25 = vsyncpa [#allocation9], 0  ;;  %2491 = vmatpush3.bf16.msra.mxu1 %v2840_v4  ;;  %2339 = vmatmul.mubr.msk.f32.vlgmr.msra.gmra.mrb[0].mxu0 %vm70_vm1, %v61_v6  ;;  %v2855_v9 = vpack.c.bf16 %v159_v8, %v158_v7  ;;  %vm2725_vm2 = vmmov 0   ;;  %v2726_v10 = vmov 0.0   ;;  %v2190_v11 = vld [vmem:[%s3373_s4] ss:$0 sm:$0xff]  ;;  %v243_v21 = vlaneseq }
   0xe   :  { %2492 = vmatprep.subr.bf16.mxu1 %v2724_v3  ;;  %2349 = vmatprep.mubr.msk.f32.mxu1 %vm2725_vm2, %v2726_v10  ;;  %v2727_v19 = vmov 1983009808   ;;  %vm160_vm3 = vcmask 261120   ;;  %vm237_vm4 = vcmask 253952   ;;  %s2728_s4 = smov 32   ;;  %vm252_vm5 = vcmask 516352  }
   0xf   :  { %2495 = vmatprep.subr.bf16.mxu0 %v2724_v3  ;;  %2360 = vmatprep.mubr.msk.f32.mxu0 %vm2725_vm2, %v2726_v10  ;;  %v241_v20 = vunpack.c.l.s4 %v2727_v19  ;;  %v2884_v23 = vshrl.u32 %v243_v21, 7  ;;  %s2729_s29 = smov 64   ;;  %s2730_s30 = smov 96   ;;  %vm345_vm6 = vcmask 778752   ;;  %vm352_vm7 = vcmask 1041152  }
  0x10   :  { %2497 = vmatpush3.bf16.msra.mxu0 %v2840_v4  ;;  %s3394_s28 = sld [smem:[#allocation13_spill]]  ;;  %vm1603_vm11 = vcmask 254977   ;;  %vm1663_vm12 = vcmask 64512   ;;  %vm1884_vm13 = vcmask 256002   ;;  %vm1886_vm14 = vcmask 257027  }
  0x11   :  { %2494 = vmatpush3.bf16.msra.mxu1 %v2855_v9  ;;  %2498 = vmatprep.subr.bf16.mxu0 %v2724_v3  ;;  %v242_v22 = vunpack.c.0.s8 %v241_v20  ;;  %vm1888_vm15 = vcmask 258052   ;;  %vm1890_vm0 = vcmask 259077   ;;  %vm1892_vm1 = vcmask 260102  }
  0x12   :  { %2501 = vmatprep.subr.bf16.mxu1 %v2724_v3 }
  0x13   :  { %v2887_v24 = vsub.s32 %v242_v22, %v2884_v23 }
  0x14   :  { %2350 = vmatmul.mubr.f32.vlgmr.msra.gmra.mrb[0].mxu1 %v2726_v10  ;;  %2500 = vmatpush3.bf16.msra.mxu0 %v2855_v9 }
  0x15   :  { %2503 = vmatpush3.bf16.msra.mxu1 %v2840_v4  ;;  %2371 = vmatprep.mubr.msk.f32.mxu1 %vm2725_vm2, %v2726_v10 }
  0x16   :  { %2504 = vmatprep.subr.bf16.mxu1 %v2724_v3  ;;  %2507 = vmatprep.subr.bf16.mxu0 %v2724_v3 }
  0x19   :  { %2506 = vmatpush3.bf16.msra.mxu1 %v2855_v9 }
  0x1a   :  { %2513 = vmatprep.subr.bf16.mxu1 %v2724_v3 }
  0xe0   :  { %v2340_v12 = vpop.f32.mrb[0].mxu0 }
  0xe1   :  { %v2879_v13 = vadd.f32 %v2340_v12, %v2190_v11  ;;  %v147_v14 = vpop.f32.mrb[1].mxu0 }
  0xe2   :  { %v2881_v15 = vadd.f32 %v2190_v11, %v147_v14 }
  0xe7   :  { %v230_v16 = vpop.f32.mrb[0].mxu1 }
  0xe8   :  { %v234_v17 = vadd.f32 %v230_v16, %v2881_v15  ;;  %v2351_v18 = vpop.f32.mrb[1].mxu1 }
  0xea   :  { %2628 = vtanh.f32 %v234_v17 }
  0xf4   :  { %v2629_v25 = vpop.eup %2628 }
  0xf5   :  { %2361 = vmatmul.mubr.msk.f32.vlgmr.msra.gmra.mrb[2].mxu0 %vm160_vm3, %v2629_v25  ;;  %v236_v26 = vmax.f32 %v2629_v25, 0.0 }
  0xf6   :  { %2509 = vmatpush3.bf16.msra.mxu0 %v2840_v4  ;;  %2382 = vmatprep.mubr.msk.f32.mxu0 %vm2725_vm2, %v2726_v10 }
  0xf7   :  { %v246_v27 = vrot.slane %v236_v26, %v2887_v24  ;;  %238 = vst.msk [vmem:[#allocation2] sm:$0x1] %vm237_vm4, %v236_v26  ;;  %2510 = vmatprep.subr.bf16.mxu0 %v2724_v3 }
  0xf9   :  { %v2194_v28 = vrot.slane %v246_v27, 9 }
  0xfa   :  { %2512 = vmatpush3.bf16.msra.mxu0 %v2855_v9 }
  0xfb   :  { %249 = vrot.lane.b32.xlu0 %v2194_v28, %s2728_s4  ;;  %2519 = vmatprep.subr.bf16.mxu0 %v2724_v3 }
 0x16d   :  { %v250_v29 = vpop.permute.xlu0 %249 }
 0x16e   :  { %253 = vst.msk [vmem:[#allocation2] sm:$0x1] %vm252_vm5, %v250_v29 }
 0x1c8   :  { %v323_v30 = vpop.f32.mrb[2].mxu0 }
 0x1c9   :  { %v328_v31 = vrot.slane %v323_v30, 6  ;;  %v2362_v32 = vpop.f32.mrb[3].mxu0 }
 0x1cb   :  { %v330_v33 = vadd.f32 %v328_v31, %v2881_v15 }
 0x1cd   :  { %2630 = vtanh.f32 %v330_v33 }
 0x1d7   :  { %v2631_v34 = vpop.eup %2630 }
 0x1d8   :  { %v355_v35 = vrot.slane %v2631_v34, 2  ;;  %v332_v36 = vmax.f32 %v2631_v34, 0.0 }
 0x1da   :  { %2372 = vmatmul.mubr.msk.f32.vlgmr.msra.gmra.mrb[2].mxu1 %vm160_vm3, %v355_v35  ;;  %v340_v37 = vrot.slane %v332_v36, %v2887_v24 }
 0x1db   :  { %2515 = vmatpush3.bf16.msra.mxu1 %v2840_v4  ;;  %2393 = vmatprep.mubr.msk.f32.mxu1 %vm2725_vm2, %v2726_v10 }
 0x1dc   :  { %v341_v38 = vcombine.high %v340_v37, %v340_v37  ;;  %2516 = vmatprep.subr.bf16.mxu1 %v2724_v3  ;;  %v938_v37 = vld [vmem:[%s3374_s5] sm:$0xff] }
 0x1de   :  { %342 = vrot.lane.b32.xlu0 %v341_v38, %s2729_s29  ;;  %v2196_v39 = vrot.slane %v341_v38, 9  ;;  %v939_v38 = vld [vmem:[%s3374_s5 + $0x8] sm:$0xff] }
 0x1df   :  { %2518 = vmatpush3.bf16.msra.mxu1 %v2855_v9 }
 0x1e0   :  { %2525 = vmatprep.subr.bf16.mxu1 %v2724_v3 }
 0x1e2   :  { %349 = vrot.lane.b32.xlu0 %v2196_v39, %s2730_s30  ;;  %v2538_v39 = vpack.c.bf16 %v939_v38, %v938_v37  ;;  %v1329_v37 = vld [vmem:[%s3382_s13 + $0xd8] sm:$0xff] }
 0x250   :  { %v343_v40 = vpop.permute.xlu0 %342 }
 0x251   :  { %346 = vst.msk [vmem:[#allocation2] sm:$0x1] %vm345_vm6, %v343_v40  ;;  %v940_v40 = vld [vmem:[%s3374_s5 + $0x10] sm:$0xff] }
 0x254   :  { %v350_v41 = vpop.permute.xlu0 %349 }
 0x255   :  { %353 = vst.msk [vmem:[#allocation2] sm:$0x1] %vm352_vm7, %v350_v41  ;;  %v941_v41 = vld [vmem:[%s3374_s5 + $0x18] sm:$0xff] }
 0x2ad   :  { %v424_v42 = vpop.f32.mrb[2].mxu1 }
 0x2ae   :  { %v429_v43 = vrot.slane %v424_v42, 4  ;;  %v2373_v44 = vpop.f32.mrb[3].mxu1  ;;  %v2541_v42 = vpack.c.bf16 %v941_v41, %v940_v40  ;;  %v1312_v40 = vld [vmem:[%s3382_s13 + $0x50] sm:$0xff]  ;;  %v1313_v41 = vld [vmem:[%s3382_s13 + $0x58] sm:$0xff] }
 0x2b0   :  { %v431_v45 = vadd.f32 %v429_v43, %v2881_v15 }
 0x2b2   :  { %2632 = vtanh.f32 %v431_v45 }
 0x2bc   :  { %v2633_v46 = vpop.eup %2632 }
 0x2bd   :  { %v452_v47 = vrot.slane %v2633_v46, 4  ;;  %v433_v48 = vmax.f32 %v2633_v46, 0.0 }
 0x2bf   :  { %2383 = vmatmul.mubr.msk.f32.vlgmr.msra.gmra.mrb[4].mxu0 %vm160_vm3, %v452_v47  ;;  %v435_v49 = vcombine.high %v433_v48, %v433_v48  ;;  %v1120_v48 = vld [vmem:[%s3378_s9] sm:$0xff] }
 0x2c0   :  { %2521 = vmatpush3.bf16.msra.mxu0 %v2840_v4  ;;  %2404 = vmatprep.mubr.msk.f32.mxu0 %vm2725_vm2, %v2726_v10 }
 0x2c1   :  { %v442_v50 = vrot.slane %v435_v49, %v2887_v24  ;;  %2522 = vmatprep.subr.bf16.mxu0 %v2724_v3  ;;  %v1121_v49 = vld [vmem:[%s3378_s9 + $0x8] sm:$0xff] }
 0x2c3   :  { %v2198_v51 = vrot.slane %v442_v50, 9  ;;  %444 = vst.msk [vmem:[#allocation2 + $0x2] sm:$0x1] %vm237_vm4, %v442_v50 }
 0x2c4   :  { %2524 = vmatpush3.bf16.msra.mxu0 %v2855_v9 }
 0x2c5   :  { %447 = vrot.lane.b32.xlu0 %v2198_v51, %s2728_s4  ;;  %2531 = vmatprep.subr.bf16.mxu0 %v2724_v3 }
 0x337   :  { %v448_v52 = vpop.permute.xlu0 %447 }
 0x338   :  { %450 = vst.msk [vmem:[#allocation2 + $0x2] sm:$0x1] %vm252_vm5, %v448_v52  ;;  %v2552_v52 = vpack.c.bf16 %v1121_v49, %v1120_v48  ;;  %v1332_v48 = vld [vmem:[%s3382_s13 + $0xf0] sm:$0xff]  ;;  %v1333_v49 = vld [vmem:[%s3382_s13 + $0xf8] sm:$0xff] }
 0x392   :  { %v521_v53 = vpop.f32.mrb[4].mxu0 }
 0x393   :  { %v526_v54 = vrot.slane %v521_v53, 2  ;;  %v2384_v55 = vpop.f32.mrb[5].mxu0 }
 0x394   :  { %v1122_v55 = vld [vmem:[%s3378_s9 + $0x10] sm:$0xff] }
 0x395   :  { %v528_v56 = vadd.f32 %v526_v54, %v2881_v15 }
 0x397   :  { %2634 = vtanh.f32 %v528_v56  ;;  %v1318_v56 = vld [vmem:[%s3382_s13 + $0x80] sm:$0xff] }
 0x3a1   :  { %v2635_v57 = vpop.eup %2634 }
 0x3a2   :  { %v552_v58 = vrot.slane %v2635_v57, 6  ;;  %v530_v59 = vmax.f32 %v2635_v57, 0.0  ;;  %v1319_v57 = vld [vmem:[%s3382_s13 + $0x88] sm:$0xff] }
 0x3a4   :  { %2394 = vmatmul.mubr.msk.f32.vlgmr.msra.gmra.mrb[4].mxu1 %vm160_vm3, %v552_v58  ;;  %v532_v60 = vcombine.high %v530_v59, %v530_v59 }
 0x3a5   :  { %2527 = vmatpush3.bf16.msra.mxu1 %v2840_v4  ;;  %2415 = vmatprep.mubr.msk.f32.mxu1 %vm2725_vm2, %v2726_v10 }
 0x3a6   :  { %v539_v61 = vrot.slane %v532_v60, %v2887_v24  ;;  %2528 = vmatprep.subr.bf16.mxu1 %v2724_v3 }
 0x3a8   :  { %v540_v62 = vcombine.high %v539_v61, %v539_v61  ;;  %v2565_v61 = vpack.c.bf16 %v1319_v57, %v1318_v56  ;;  %v947_v57 = vld [vmem:[%s3376_s7 + $0x20] sm:$0xff] }
 0x3a9   :  { %2530 = vmatpush3.bf16.msra.mxu1 %v2855_v9 }
 0x3aa   :  { %541 = vrot.lane.b32.xlu1 %v540_v62, %s2729_s29  ;;  %2537 = vmatprep.subr.bf16.mxu1 %v2724_v3  ;;  %v2200_v63 = vrot.slane %v540_v62, 9  ;;  %v1302_v62 = vld [vmem:[%s3382_s13] sm:$0xff] }
 0x3ae   :  { %547 = vrot.lane.b32.xlu1 %v2200_v63, %s2730_s30  ;;  %v1303_v63 = vld [vmem:[%s3382_s13 + $0x8] sm:$0xff] }
 0x41c   :  { %v542_v0 = vpop.permute.xlu1 %541 }
 0x41d   :  { %544 = vst.msk [vmem:[#allocation2 + $0x2] sm:$0x1] %vm345_vm6, %v542_v0  ;;  %v1321_v0 = vld [vmem:[%s3382_s13 + $0x98] sm:$0xff] }
 0x420   :  { %v548_v1 = vpop.permute.xlu1 %547 }
 0x421   :  { %550 = vst.msk [vmem:[#allocation2 + $0x2] sm:$0x1] %vm352_vm7, %v548_v1  ;;  %v1119_v1 = vld [vmem:[%s3394_s28] sm:$0x3] }
 0x477   :  { %v621_v2 = vpop.f32.mrb[4].mxu1 }
 0x478   :  { %v625_v5 = vadd.f32 %v621_v2, %v2879_v13  ;;  %v2395_v6 = vpop.f32.mrb[5].mxu1  ;;  %v2567_v2 = vpack.c.bf16 %v1303_v63, %v1302_v62 }
 0x479   :  { %v1305_v6 = vld [vmem:[%s3382_s13 + $0x18] sm:$0xff] }
 0x47a   :  { %2636 = vtanh.f32 %v625_v5  ;;  %v1304_v5 = vld [vmem:[%s3382_s13 + $0x10] sm:$0xff] }
 0x484   :  { %v2637_v7 = vpop.eup %2636 }
 0x485   :  { %2405 = vmatmul.mubr.msk.f32.vlgmr.msra.gmra.mrb[6].mxu0 %vm160_vm3, %v2637_v7  ;;  %v627_v8 = vmax.f32 %v2637_v7, 0.0 }
 0x486   :  { %2533 = vmatpush3.bf16.msra.mxu0 %v2840_v4  ;;  %2426 = vmatprep.mubr.msk.f32.mxu0 %vm2725_vm2, %v2726_v10 }
 0x487   :  { %v636_v11 = vrot.slane %v627_v8, %v2887_v24  ;;  %628 = vst.msk [vmem:[#allocation2 + $0x1] sm:$0x1] %vm237_vm4, %v627_v8  ;;  %2534 = vmatprep.subr.bf16.mxu0 %v2724_v3 }
 0x489   :  { %v2202_v12 = vrot.slane %v636_v11, 9  ;;  %v944_v11 = vld [vmem:[%s3376_s7 + $0x8] sm:$0xff] }
 0x48a   :  { %2536 = vmatpush3.bf16.msra.mxu0 %v2855_v9 }
 0x48b   :  { %639 = vrot.lane.b32.xlu1 %v2202_v12, %s2728_s4  ;;  %v946_v12 = vld [vmem:[%s3376_s7 + $0x18] sm:$0xff] }
 0x4fd   :  { %v640_v14 = vpop.permute.xlu1 %639 }
 0x4fe   :  { %642 = vst.msk [vmem:[#allocation2 + $0x1] sm:$0x1] %vm252_vm5, %v640_v14  ;;  %v943_v14 = vld [vmem:[%s3376_s7] sm:$0xff] }
 0x558   :  { %v712_v15 = vpop.f32.mrb[6].mxu0 }
 0x559   :  { %v717_v16 = vrot.slane %v712_v15, 6  ;;  %v2406_v4 = vpop.f32.mrb[7].mxu0  ;;  %v1322_v15 = vld [vmem:[%s3382_s13 + $0xa0] sm:$0xff] }
 0x55a   :  { %v2543_v4 = vpack.c.bf16 %v946_v12, %v944_v11  ;;  %v1130_v12 = vld [vmem:[%s3380_s11 + $0x28] sm:$0xff] }
 0x55b   :  { %v719_v17 = vadd.f32 %v717_v16, %v2879_v13  ;;  %v1323_v16 = vld [vmem:[%s3382_s13 + $0xa8] sm:$0xff] }
 0x55c   :  { %2544 = vmatprep.subr.bf16.mxu0 %v2543_v4 }
 0x55d   :  { %2638 = vtanh.f32 %v719_v17  ;;  %v945_v17 = vld [vmem:[%s3376_s7 + $0x10] sm:$0xff] }
 0x567   :  { %v2639_v18 = vpop.eup %2638 }
 0x568   :  { %v742_v19 = vrot.slane %v2639_v18, 2  ;;  %v721_v20 = vmax.f32 %v2639_v18, 0.0  ;;  %v2545_v18 = vpack.c.bf16 %v945_v17, %v943_v14  ;;  %v1132_v14 = vld [vmem:[%s3380_s11 + $0x38] sm:$0xff]  ;;  %v1129_v17 = vld [vmem:[%s3380_s11 + $0x20] sm:$0xff] }
 0x569   :  { %v2561_v4 = vpack.c.bf16 %v1132_v14, %v1130_v12 }
 0x56a   :  { %2416 = vmatmul.mubr.msk.f32.vlgmr.msra.gmra.mrb[6].mxu1 %vm160_vm3, %v742_v19  ;;  %v729_v21 = vrot.slane %v721_v20, %v2887_v24  ;;  %v2571_v19 = vpack.c.bf16 %v1305_v6, %v1304_v5  ;;  %v2573_v20 = vpack.c.bf16 %v1323_v16, %v1322_v15  ;;  %v1125_v6 = vld [vmem:[%s3380_s11] sm:$0xff] }
 0x56b   :  { %2437 = vmatprep.mubr.msk.f32.mxu1 %vm2725_vm2, %v2726_v10  ;;  %2539 = vmatpush3.bf16.msra.mxu1 %v2538_v39 }
 0x56c   :  { %v730_v9 = vcombine.high %v729_v21, %v729_v21  ;;  %2540 = vmatprep.subr.bf16.mxu1 %v2724_v3  ;;  %v1306_v21 = vld [vmem:[%s3382_s13 + $0x20] sm:$0xff] }
 0x56e   :  { %731 = vrot.lane.b32.xlu0 %v730_v9, %s2729_s29  ;;  %v2204_v22 = vrot.slane %v730_v9, 9  ;;  %v1307_v9 = vld [vmem:[%s3382_s13 + $0x28] sm:$0xff] }
 0x56f   :  { %2542 = vmatpush3.bf16.msra.mxu1 %v2541_v42  ;;  %v1330_v42 = vld [vmem:[%s3382_s13 + $0xe0] sm:$0xff] }
 0x570   :  { %2551 = vmatprep.subr.bf16.mxu1 %v2724_v3 }
 0x572   :  { %737 = vrot.lane.b32.xlu0 %v2204_v22, %s2730_s30  ;;  %v1324_v22 = vld [vmem:[%s3382_s13 + $0xb0] sm:$0xff] }
 0x5e0   :  { %v732_v25 = vpop.permute.xlu0 %731 }
 0x5e1   :  { %734 = vst.msk [vmem:[#allocation2 + $0x1] sm:$0x1] %vm345_vm6, %v732_v25  ;;  %v1325_v25 = vld [vmem:[%s3382_s13 + $0xb8] sm:$0xff] }
 0x5e4   :  { %v738_v26 = vpop.permute.xlu0 %737 }
 0x5e5   :  { %740 = vst.msk [vmem:[#allocation2 + $0x1] sm:$0x1] %vm352_vm7, %v738_v26  ;;  %v2575_v26 = vpack.c.bf16 %v1307_v9, %v1306_v21  ;;  %v1338_v21 = vld [vmem:[%s3384_s15 + $0x18] sm:$0xff]  ;;  %v2212_v9 = vld [vmem:[%s3379_s10] ss:$0 sm:$0xff] }
 0x63d   :  { %v811_v27 = vpop.f32.mrb[6].mxu1 }
 0x63e   :  { %v816_v28 = vrot.slane %v811_v27, 4  ;;  %v2417_v29 = vpop.f32.mrb[7].mxu1  ;;  %v2577_v27 = vpack.c.bf16 %v1325_v25, %v1324_v22 }
 0x63f   :  { %v1309_v29 = vld [vmem:[%s3382_s13 + $0x38] sm:$0xff] }
 0x640   :  { %v818_v30 = vadd.f32 %v816_v28, %v2879_v13  ;;  %v1308_v28 = vld [vmem:[%s3382_s13 + $0x30] sm:$0xff] }
 0x642   :  { %2640 = vtanh.f32 %v818_v30  ;;  %v1326_v30 = vld [vmem:[%s3382_s13 + $0xc0] sm:$0xff] }
 0x64c   :  { %v2641_v31 = vpop.eup %2640 }
 0x64d   :  { %v839_v32 = vrot.slane %v2641_v31, 4  ;;  %v820_v33 = vmax.f32 %v2641_v31, 0.0  ;;  %v1327_v31 = vld [vmem:[%s3382_s13 + $0xc8] sm:$0xff] }
 0x64f   :  { %2427 = vmatmul.mubr.msk.f32.vlgmr.msra.gmra.mrb[8].mxu0 %vm160_vm3, %v839_v32  ;;  %v822_v34 = vcombine.high %v820_v33, %v820_v33  ;;  %v2579_v32 = vpack.c.bf16 %v1309_v29, %v1308_v28  ;;  %v2581_v33 = vpack.c.bf16 %v1327_v31, %v1326_v30  ;;  %v1337_v28 = vld [vmem:[%s3384_s15 + $0x10] sm:$0xff]  ;;  %v1340_v31 = vld [vmem:[%s3384_s15 + $0x28] sm:$0xff] }
 0x650   :  { %1112 = vmatprep.mubr.f32.mxu0 %v2726_v10  ;;  %2546 = vmatpush1.bf16.msra.mxu0 %v2545_v18  ;;  %v1131_v18 = vld [vmem:[%s3380_s11 + $0x30] sm:$0xff] }
 0x651   :  { %v829_v35 = vrot.slane %v822_v34, %v2887_v24  ;;  %v1310_v34 = vld [vmem:[%s3382_s13 + $0x40] sm:$0xff]  ;;  %v2563_v22 = vpack.c.bf16 %v1131_v18, %v1129_v17 }
 0x653   :  { %v2206_v36 = vrot.slane %v829_v35, 9  ;;  %831 = vst.msk [vmem:[#allocation2 + $0x3] sm:$0x1] %vm237_vm4, %v829_v35  ;;  %v1311_v35 = vld [vmem:[%s3382_s13 + $0x48] sm:$0xff] }
 0x654   :  { %v2583_v38 = vpack.c.bf16 %v1311_v35, %v1310_v34 }
 0x655   :  { %834 = vrot.lane.b32.xlu1 %v2206_v36, %s2728_s4  ;;  %v1328_v36 = vld [vmem:[%s3382_s13 + $0xd0] sm:$0xff] }
 0x656   :  { %v2585_v39 = vpack.c.bf16 %v1329_v37, %v1328_v36  ;;  %v1339_v36 = vld [vmem:[%s3384_s15 + $0x20] sm:$0xff]  ;;  %v1341_v37 = vld [vmem:[%s3384_s15 + $0x30] sm:$0xff] }
 0x6c7   :  { %v835_v43 = vpop.permute.xlu1 %834 }
 0x6c8   :  { %837 = vst.msk [vmem:[#allocation2 + $0x3] sm:$0x1] %vm252_vm5, %v835_v43  ;;  %v1331_v43 = vld [vmem:[%s3382_s13 + $0xe8] sm:$0xff]  ;;  %vm1894_vm5 = vcmask 261127  }
 0x722   :  { %v908_v44 = vpop.f32.mrb[8].mxu0 }
 0x723   :  { %v913_v45 = vrot.slane %v908_v44, 2  ;;  %v2428_v46 = vpop.f32.mrb[9].mxu0  ;;  %v2587_v44 = vpack.c.bf16 %v1313_v41, %v1312_v40  ;;  %v2215_v41 = vld [vmem:[%s3383_s14] ss:$0 sm:$0xff] }
 0x724   :  { %v1314_v46 = vld [vmem:[%s3382_s13 + $0x60] sm:$0xff] }
 0x725   :  { %v915_v47 = vadd.f32 %v913_v45, %v2879_v13  ;;  %v1123_v13 = vld [vmem:[%s3378_s9 + $0x18] sm:$0xff]  ;;  %v2589_v45 = vpack.c.bf16 %v1331_v43, %v1330_v42 }
 0x726   :  { %v2555_v59 = vpack.c.bf16 %v1123_v13, %v1122_v55  ;;  %v948_v55 = vld [vmem:[%s3376_s7 + $0x28] sm:$0xff]  ;;  %v950_v13 = vld [vmem:[%s3376_s7 + $0x38] sm:$0xff] }
 0x727   :  { %2642 = vtanh.f32 %v915_v47  ;;  %v1315_v47 = vld [vmem:[%s3382_s13 + $0x68] sm:$0xff]  ;;  %v2547_v56 = vpack.c.bf16 %v950_v13, %v948_v55  ;;  %v1133_v13 = vld [vmem:[%s3381_s12] sm:$0x3] }
 0x729   :  { %2548 = vmatprep.subr.bf16.mxu0 %v2547_v56 }
 0x731   :  { %v2643_v50 = vpop.eup %2642 }
 0x732   :  { %v917_v51 = vmax.f32 %v2643_v50, 0.0  ;;  %v2591_v50 = vpack.c.bf16 %v1315_v47, %v1314_v46  ;;  %v3188_v47 = vsub.s32 0, %v2884_v23 }
 0x734   :  { %v958_v53 = vrot.slane %v917_v51, 6  ;;  %v919_v54 = vcombine.high %v917_v51, %v917_v51  ;;  %v2593_v51 = vpack.c.bf16 %v1333_v49, %v1332_v48  ;;  %v951_v48 = vld [vmem:[%s3377_s8] sm:$0x3]  ;;  %v3194_v49 = vsub.s32 1, %v2884_v23 }
 0x735   :  { %v1220_v23 = vrot.slane %v1133_v13, %v3188_v47 }
 0x736   :  { %2438 = vmatmul.mubr.msk.f32.vlgmr.msra.gmra.mrb[8].mxu1 %vm160_vm3, %v958_v53  ;;  %v926_v58 = vrot.slane %v919_v54, %v2887_v24  ;;  %v1320_v24 = vld [vmem:[%s3382_s13 + $0x90] sm:$0xff]  ;;  %v1317_v53 = vld [vmem:[%s3382_s13 + $0x78] sm:$0xff]  ;;  %v1224_v56 = vrot.slane %v1133_v13, %v3194_v49 }
 0x737   :  { %2553 = vmatpush3.bf16.msra.mxu1 %v2552_v52  ;;  %2448 = vmatprep.mubr.msk.f32.mxu1 %vm2725_vm2, %v2726_v10  ;;  %v2569_v8 = vpack.c.bf16 %v1321_v0, %v1320_v24  ;;  %v1316_v52 = vld [vmem:[%s3382_s13 + $0x70] sm:$0xff] }
 0x738   :  { %v927_v60 = vcombine.high %v926_v58, %v926_v58  ;;  %2554 = vmatprep.subr.bf16.mxu1 %v2724_v3  ;;  %v2595_v54 = vpack.c.bf16 %v1317_v53, %v1316_v52  ;;  %v949_v58 = vld [vmem:[%s3376_s7 + $0x30] sm:$0xff] }
 0x73a   :  { %928 = vrot.lane.b32.xlu1 %v927_v60, %s2729_s29  ;;  %v2208_v7 = vrot.slane %v927_v60, 9  ;;  %v1126_v60 = vld [vmem:[%s3380_s11 + $0x8] sm:$0xff] }
 0x73b   :  { %2556 = vmatpush3.bf16.msra.mxu1 %v2555_v59  ;;  %v2549_v59 = vpack.c.bf16 %v949_v58, %v947_v57 }
 0x73c   :  { %2566 = vmatprep.subr.bf16.mxu1 %v2565_v61  ;;  %v1128_v61 = vld [vmem:[%s3380_s11 + $0x18] sm:$0xff] }
 0x73d   :  { %2550 = vmatpush1.bf16.msra.mxu0 %v2549_v59  ;;  %v2557_v62 = vpack.c.bf16 %v1128_v61, %v1126_v60 }
 0x73e   :  { %934 = vrot.lane.b32.xlu1 %v2208_v7, %s2730_s30  ;;  %2449 = vmatmul.mubr.msk.f32.vlgmr.msra.gmra.mrb[10].mxu1 %vm160_vm3, %v1119_v1  ;;  %v1127_v7 = vld [vmem:[%s3380_s11 + $0x10] sm:$0xff] }
 0x73f   :  { %2568 = vmatpush3.bf16.msra.mxu1 %v2567_v2  ;;  %2558 = vmatprep.subr.bf16.mxu0 %v2557_v62  ;;  %v2209_v2 = vld [vmem:[%s3375_s6] ss:$0 sm:$0xff]  ;;  %v2559_v16 = vpack.c.bf16 %v1127_v7, %v1125_v6 }
 0x740   :  { %2570 = vmatprep.subr.bf16.mxu1 %v2569_v8  ;;  %v1343_v6 = vld [vmem:[%s3385_s16] sm:$0x3]  ;;  %s2731_s16 = smov [#allocation8]  }
 0x741   :  { %v1438_v12 = vrot.slane %v1343_v6, %v3188_v47  ;;  %v1442_v14 = vrot.slane %v1343_v6, %v3194_v49 }
 0x743   :  { %2572 = vmatpush3.bf16.msra.mxu1 %v2571_v19 }
 0x744   :  { %2574 = vmatprep.subr.bf16.mxu1 %v2573_v20  ;;  %v1336_v20 = vld [vmem:[%s3384_s15 + $0x8] sm:$0xff] }
 0x747   :  { %2576 = vmatpush3.bf16.msra.mxu1 %v2575_v26  ;;  %v2597_v26 = vpack.c.bf16 %v1338_v21, %v1336_v20 }
 0x748   :  { %2578 = vmatprep.subr.bf16.mxu1 %v2577_v27  ;;  %v1335_v27 = vld [vmem:[%s3384_s15] sm:$0xff] }
 0x749   :  { %v2599_v34 = vpack.c.bf16 %v1337_v28, %v1335_v27 }
 0x74b   :  { %2580 = vmatpush3.bf16.msra.mxu1 %v2579_v32  ;;  %v1342_v32 = vld [vmem:[%s3384_s15 + $0x38] sm:$0xff] }
 0x74c   :  { %2582 = vmatprep.subr.bf16.mxu1 %v2581_v33  ;;  %v2601_v35 = vpack.c.bf16 %v1342_v32, %v1340_v31 }
 0x74f   :  { %2584 = vmatpush3.bf16.msra.mxu1 %v2583_v38 }
 0x750   :  { %2586 = vmatprep.subr.bf16.mxu1 %v2585_v39  ;;  %v2603_v39 = vpack.c.bf16 %v1341_v37, %v1339_v36 }
 0x753   :  { %2588 = vmatpush3.bf16.msra.mxu1 %v2587_v44 }
 0x754   :  { %2590 = vmatprep.subr.bf16.mxu1 %v2589_v45 }
 0x757   :  { %2592 = vmatpush3.bf16.msra.mxu1 %v2591_v50  ;;  %v1038_v50 = vrot.slane %v951_v48, %v3188_v47 }
 0x758   :  { %2594 = vmatprep.subr.bf16.mxu1 %v2593_v51  ;;  %v1042_v51 = vrot.slane %v951_v48, %v3194_v49 }
 0x75b   :  { %2596 = vmatpush3.bf16.msra.mxu1 %v2595_v54 }
 0x7ac   :  { %v929_v63 = vpop.permute.xlu1 %928 }
 0x7ad   :  { %931 = vst.msk [vmem:[#allocation2 + $0x3] sm:$0x1] %vm345_vm6, %v929_v63 }
 0x7b0   :  { %v935_v24 = vpop.permute.xlu1 %934 }
 0x7b1   :  { %937 = vst.msk [vmem:[#allocation2 + $0x3] sm:$0x1] %vm352_vm7, %v935_v24 }
 0x7b8   :  { %v2216_v0 = vld.sshfl [vmem:[#allocation2] sm:$0x33 pattern:$0x76325410] }
 0x7b9   :  { %v1358_v1 = vcombine.high %v2216_v0, %v2216_v0 }
 0x7bb   :  { %1425 = vmatprep.mubr.f32.mxu1 %v1358_v1 }
 0x7bc   :  { %1426 = vmatmul.mubr.f32.vlgmr.msra.gmra.mrb[12].mxu1 %v2216_v0 }
 0x809   :  { %v1027_v5 = vpop.f32.mrb[8].mxu1 }
 0x80a   :  { %v1028_v8 = vadd.f32 %v2209_v2, %v1027_v5  ;;  %v2439_v11 = vpop.f32.mrb[9].mxu1 }
 0x80c   :  { %vm1031_vm8 = vcmp.gt.f32.partialorder %v1028_v8, 0.0  ;;  %v1032_v15 = vmul.f32 0.01, %v1028_v8 }
 0x80e   :  { %v1033_v19 = vsel %vm1031_vm8, %v1028_v8, %v1032_v15 }
 0x80f   :  { %2211 = vmatmul.mubr.msk.f32.vlgmr.msra.gmra.mrb[10].mxu0 %vm160_vm3, %v1033_v19 }
 0x810   :  { %2560 = vmatpush1.bf16.msra.mxu0 %v2559_v16  ;;  %1294 = vmatprep.mubr.f32.mxu0 %v2726_v10 }
 0x811   :  { %v1209_v25 = vpop.f32.mrb[10].mxu1  ;;  %2562 = vmatprep.subr.bf16.mxu0 %v2561_v4 }
 0x812   :  { %v1210_v29 = vadd.f32 %v2212_v9, %v1209_v25  ;;  %v2450_v30 = vpop.f32.mrb[11].mxu1 }
 0x814   :  { %vm1213_vm9 = vcmp.gt.f32.partialorder %v1210_v29, 0.0  ;;  %v1214_v33 = vmul.f32 0.01, %v1210_v29  ;;  %2564 = vmatpush1.bf16.msra.mxu0 %v2563_v22 }
 0x815   :  { %2598 = vmatprep.subr.bf16.mxu0 %v2597_v26 }
 0x816   :  { %v1215_v38 = vsel %vm1213_vm9, %v1210_v29, %v1214_v33 }
 0x817   :  { %2214 = vmatmul.mubr.msk.f32.vlgmr.msra.gmra.mrb[12].mxu0 %vm160_vm3, %v1215_v38 }
 0x818   :  { %2600 = vmatpush1.bf16.msra.mxu0 %v2599_v34  ;;  %1512 = vmatprep.mubr.f32.mxu0 %v2726_v10 }
 0x819   :  { %2602 = vmatprep.subr.bf16.mxu0 %v2601_v35 }
 0x81c   :  { %2604 = vmatpush1.bf16.msra.mxu0 %v2603_v39 }
 0x88f   :  { %v2313_v40 = vpop.f32.mrb[12].mxu1 }
 0x890   :  { %v2314_v42 = vpop.f32.mrb[13].mxu1 }
 0x891   :  { %v2315_v43 = vadd.f32 %v2314_v42, %v2313_v40 }
 0x893   :  { %v1428_v44 = vadd.f32 %v2315_v43, %v2215_v41 }
 0x895   :  { %vm1431_vm10 = vcmp.gt.f32.partialorder %v1428_v44, 0.0  ;;  %v1432_v45 = vmul.f32 0.01, %v1428_v44 }
 0x897   :  { %v1433_v46 = vsel %vm1431_vm10, %v1428_v44, %v1432_v45 }
 0x898   :  { %2217 = vmatmul.mubr.msk.f32.vlgmr.msra.gmra.mrb[14].mxu0 %vm160_vm3, %v1433_v46 }
 0x8e2   :  { %v1114_v52 = vpop.f32.mrb[10].mxu0 }
 0x8e3   :  { %v1115_v53 = vadd.f32 %v1114_v52, %v1038_v50  ;;  %v1116_v54 = vpop.f32.mrb[11].mxu0 }
 0x8e4   :  { %v1117_v55 = vadd.f32 %v1116_v54, %v1042_v51 }
 0x8e5   :  { %1519 = vst.msk [vmem:[#allocation3] sm:$0x1] %vm237_vm4, %v1115_v53  ;;  %1537 = vrot.lane.b32.xlu1 %v1115_v53, %s2729_s29  ;;  %1523 = vrot.lane.b32.xlu0 %v1115_v53, %s2730_s30 }
 0x8e6   :  { %1604 = vst.msk [vmem:[#allocation3 + $0x7] sm:$0x2] %vm1603_vm11, %v1115_v53  ;;  %1616 = vst.msk [vmem:[#allocation3 + $0xb] sm:$0x2] %vm1603_vm11, %v1117_v55 }
 0x8e7   :  { %1561 = vst.msk [vmem:[#allocation3 + $0x4] sm:$0x1] %vm237_vm4, %v1117_v55 }
 0x8e9   :  { %1565 = vrot.lane.b32.xlu1 %v1117_v55, %s2730_s30  ;;  %1549 = vrot.lane.b32.xlu0 %v1115_v53, %s2728_s4 }
 0x8ea   :  { %v1296_v57 = vpop.f32.mrb[12].mxu0 }
 0x8eb   :  { %v1297_v58 = vadd.f32 %v1296_v57, %v1220_v23  ;;  %v1298_v59 = vpop.f32.mrb[13].mxu0 }
 0x8ec   :  { %v1299_v60 = vadd.f32 %v1298_v59, %v1224_v56 }
 0x8ed   :  { %1591 = vrot.lane.b32.xlu1 %v1117_v55, %s2728_s4  ;;  %1579 = vrot.lane.b32.xlu0 %v1117_v55, %s2729_s29  ;;  %1520 = vst.msk [vmem:[#allocation4] sm:$0x1] %vm237_vm4, %v1297_v58 }
 0x8ee   :  { %1605 = vst.msk [vmem:[#allocation4 + $0x7] sm:$0x2] %vm1603_vm11, %v1297_v58  ;;  %1617 = vst.msk [vmem:[#allocation4 + $0xb] sm:$0x2] %vm1603_vm11, %v1299_v60 }
 0x8ef   :  { %1562 = vst.msk [vmem:[#allocation4 + $0x4] sm:$0x1] %vm237_vm4, %v1299_v60 }
 0x8f1   :  { %1541 = vrot.lane.b32.xlu1 %v1297_v58, %s2729_s29  ;;  %1528 = vrot.lane.b32.xlu0 %v1297_v58, %s2730_s30 }
 0x8f5   :  { %1570 = vrot.lane.b32.xlu1 %v1299_v60, %s2730_s30  ;;  %1553 = vrot.lane.b32.xlu0 %v1297_v58, %s2728_s4 }
 0x8f9   :  { %1595 = vrot.lane.b32.xlu1 %v1299_v60, %s2728_s4  ;;  %1583 = vrot.lane.b32.xlu0 %v1299_v60, %s2729_s29 }
 0x957   :  { %v1538_v61 = vpop.permute.xlu1 %1537  ;;  %v1524_v62 = vpop.permute.xlu0 %1523 }
 0x958   :  { %1540 = vst.msk [vmem:[#allocation3 + $0x2] sm:$0x1] %vm237_vm4, %v1538_v61  ;;  %1526 = vst.msk [vmem:[#allocation3 + $0x1] sm:$0x1] %vm237_vm4, %v1524_v62 }
 0x959   :  { %1610 = vst.msk [vmem:[#allocation3 + $0x9] sm:$0x2] %vm1603_vm11, %v1538_v61  ;;  %1607 = vst.msk [vmem:[#allocation3 + $0x8] sm:$0x2] %vm1603_vm11, %v1524_v62 }
 0x95b   :  { %v1566_v63 = vpop.permute.xlu1 %1565  ;;  %v1550_v24 = vpop.permute.xlu0 %1549 }
 0x95c   :  { %1568 = vst.msk [vmem:[#allocation3 + $0x5] sm:$0x1] %vm237_vm4, %v1566_v63  ;;  %1552 = vst.msk [vmem:[#allocation3 + $0x3] sm:$0x1] %vm237_vm4, %v1550_v24 }
 0x95d   :  { %1619 = vst.msk [vmem:[#allocation3 + $0xc] sm:$0x2] %vm1603_vm11, %v1566_v63  ;;  %1613 = vst.msk [vmem:[#allocation3 + $0xa] sm:$0x2] %vm1603_vm11, %v1550_v24 }
 0x95f   :  { %v1592_v0 = vpop.permute.xlu1 %1591  ;;  %v1580_v1 = vpop.permute.xlu0 %1579 }
 0x960   :  { %1594 = vst.msk [vmem:[#allocation3 + $0x7] sm:$0x1] %vm237_vm4, %v1592_v0  ;;  %1582 = vst.msk [vmem:[#allocation3 + $0x6] sm:$0x1] %vm237_vm4, %v1580_v1 }
 0x961   :  { %1625 = vst.msk [vmem:[#allocation3 + $0xe] sm:$0x2] %vm1603_vm11, %v1592_v0  ;;  %1622 = vst.msk [vmem:[#allocation3 + $0xd] sm:$0x2] %vm1603_vm11, %v1580_v1 }
 0x963   :  { %v1542_v2 = vpop.permute.xlu1 %1541  ;;  %v1529_v5 = vpop.permute.xlu0 %1528 }
 0x964   :  { %1544 = vst.msk [vmem:[#allocation4 + $0x2] sm:$0x1] %vm237_vm4, %v1542_v2  ;;  %1531 = vst.msk [vmem:[#allocation4 + $0x1] sm:$0x1] %vm237_vm4, %v1529_v5 }
 0x965   :  { %1611 = vst.msk [vmem:[#allocation4 + $0x9] sm:$0x2] %vm1603_vm11, %v1542_v2  ;;  %1608 = vst.msk [vmem:[#allocation4 + $0x8] sm:$0x2] %vm1603_vm11, %v1529_v5 }
 0x967   :  { %v1571_v7 = vpop.permute.xlu1 %1570  ;;  %v1554_v8 = vpop.permute.xlu0 %1553  ;;  %v1628_v11 = vld [vmem:[#allocation3] sm:$0xff] }
 0x968   :  { %1573 = vst.msk [vmem:[#allocation4 + $0x5] sm:$0x1] %vm237_vm4, %v1571_v7  ;;  %1556 = vst.msk [vmem:[#allocation4 + $0x3] sm:$0x1] %vm237_vm4, %v1554_v8  ;;  %1631 = vxpose.xlu0.b32.start.end [1/1] (short) (narrow) %v1628_v11, 32  ;;  %v1896_v57 = vld [vmem:[#allocation3 + $0x8] sm:$0xff] }
 0x969   :  { %1620 = vst.msk [vmem:[#allocation4 + $0xc] sm:$0x2] %vm1603_vm11, %v1571_v7  ;;  %1614 = vst.msk [vmem:[#allocation4 + $0xa] sm:$0x2] %vm1603_vm11, %v1554_v8 }
 0x96b   :  { %v1596_v15 = vpop.permute.xlu1 %1595  ;;  %v1584_v16 = vpop.permute.xlu0 %1583 }
 0x96c   :  { %1598 = vst.msk [vmem:[#allocation4 + $0x7] sm:$0x1] %vm237_vm4, %v1596_v15  ;;  %1586 = vst.msk [vmem:[#allocation4 + $0x6] sm:$0x1] %vm237_vm4, %v1584_v16  ;;  %v1514_v4 = vpop.f32.mrb[14].mxu0 }
 0x96d   :  { %1626 = vst.msk [vmem:[#allocation4 + $0xe] sm:$0x2] %vm1603_vm11, %v1596_v15  ;;  %1623 = vst.msk [vmem:[#allocation4 + $0xd] sm:$0x2] %vm1603_vm11, %v1584_v16  ;;  %v1515_v17 = vadd.f32 %v1514_v4, %v1438_v12  ;;  %v1516_v18 = vpop.f32.mrb[15].mxu0 }
 0x96e   :  { %v3252_v19 = vadd.f32 %v1516_v18, %v1442_v14 }
 0x96f   :  { %1521 = vst.msk [vmem:[#allocation5] sm:$0x1] %vm237_vm4, %v1515_v17  ;;  %1533 = vrot.lane.b32.xlu1 %v1515_v17, %s2730_s30 }
 0x970   :  { %1606 = vst.msk [vmem:[#allocation5 + $0x7] sm:$0x2] %vm1603_vm11, %v1515_v17  ;;  %1618 = vst.msk [vmem:[#allocation5 + $0xb] sm:$0x2] %vm1603_vm11, %v3252_v19 }
 0x971   :  { %1563 = vst.msk [vmem:[#allocation5 + $0x4] sm:$0x1] %vm237_vm4, %v3252_v19 }
 0x973   :  { %1545 = vrot.lane.b32.xlu1 %v1515_v17, %s2729_s29  ;;  %v1629_v20 = vld [vmem:[#allocation4] sm:$0xff] }
 0x974   :  { %2451 = vmatprep.subr.mxu0 %v1629_v20  ;;  %v1897_v12 = vld [vmem:[#allocation4 + $0x8] sm:$0xff] }
 0x975   :  { %2452 = vmatpush3.msra.mxu0 %v1629_v20 }
 0x976   :  { %2605 = vmatprep.subr.bf16.mxu0 %v2724_v3 }
 0x9e1   :  { %v1534_v21 = vpop.permute.xlu1 %1533 }
 0x9e2   :  { %1536 = vst.msk [vmem:[#allocation5 + $0x1] sm:$0x1] %vm237_vm4, %v1534_v21 }
 0x9e3   :  { %1609 = vst.msk [vmem:[#allocation5 + $0x8] sm:$0x2] %vm1603_vm11, %v1534_v21 }
 0x9e5   :  { %v1546_v9 = vpop.permute.xlu1 %1545 }
 0x9e6   :  { %1548 = vst.msk [vmem:[#allocation5 + $0x2] sm:$0x1] %vm237_vm4, %v1546_v9 }
 0x9e7   :  { %1612 = vst.msk [vmem:[#allocation5 + $0x9] sm:$0x2] %vm1603_vm11, %v1546_v9 }
 0x9e8   :  { %v1647_v22 = vpop.trf.xlu0 }
 0x9e9   :  { %2453 = vmatprep.mubr.msk.f32.mxu0 %vm1663_vm12, %v1647_v22 }
 0x9ec   :  { %v1648_v25 = vpop.trf.xlu0 }
 0x9ed   :  { %2454 = vmatmul.mubr.msk.f32.vlgmr.msra.gmra.mrb[16].mxu0 %vm1663_vm12, %v1648_v25 }
 0x9f0   :  { %v1649_v26 = vpop.trf.xlu0 }
 0x9f1   :  { %2456 = vmatprep.mubr.msk.f32.mxu0 %vm1663_vm12, %v1649_v26 }
 0x9f4   :  { %v1650_v27 = vpop.trf.xlu0 }
 0x9f5   :  { %2457 = vmatmul.mubr.msk.f32.gmra.mrb[18].mxu0 %vm1663_vm12, %v1650_v27 }
 0x9f6   :  { %2467 = vmatprep.mubr.msk.f32.mxu0 %vm2725_vm2, %v2726_v10 }
 0xac0   :  { %v2455_v28 = vpop.f32.mrb[16].mxu0 }
 0xac1   :  { %v1742_v29 = vpop.f32.mrb[17].mxu0  ;;  %v1764_v30 = vsel %vm160_vm3, %v2455_v28, -inf }
 0xac2   :  { %1765 = vmax.xlane.f32.xlu0 %v1764_v30  ;;  %v1761_v31 = vsel %vm160_vm3, %v1742_v29, -inf }
 0xac3   :  { %1762 = vmax.xlane.f32.xlu1 %v1761_v31 }
 0xac8   :  { %v2458_v32 = vpop.f32.mrb[18].mxu0 }
 0xac9   :  { %v1752_v33 = vpop.f32.mrb[19].mxu0  ;;  %v1770_v34 = vsel %vm160_vm3, %v2458_v32, -inf }
 0xaca   :  { %1771 = vmax.xlane.f32.xlu1 %v1770_v34  ;;  %v1767_v35 = vsel %vm160_vm3, %v1752_v33, -inf }
 0xace   :  { %1768 = vmax.xlane.f32.xlu1 %v1767_v35 }
 0xad8   :  { %1587 = vrot.lane.b32.xlu0 %v3252_v19, %s2729_s29 }
 0xadf   :  { %1557 = vrot.lane.b32.xlu1 %v1515_v17, %s2728_s4 }
 0xae3   :  { %1575 = vrot.lane.b32.xlu1 %v3252_v19, %s2730_s30 }
 0xb4f   :  { %v1766_v36 = vpop.xlane.xlu0 %1765 }
 0xb50   :  { %v1774_v37 = vsub.f32 %v2455_v28, %v1766_v36  ;;  %v1763_v38 = vpop.xlane.xlu1 %1762 }
 0xb51   :  { %v1773_v39 = vsub.f32 %v1742_v29, %v1763_v38 }
 0xb52   :  { %v1779_v40 = vmul.f32 1.442695, %v1774_v37 }
 0xb53   :  { %v1777_v41 = vmul.f32 1.442695, %v1773_v39  ;;  %v1588_v42 = vpop.permute.xlu0 %1587 }
 0xb54   :  { %2644 = vpow2.f32 %v1779_v40  ;;  %1590 = vst.msk [vmem:[#allocation5 + $0x6] sm:$0x1] %vm237_vm4, %v1588_v42 }
 0xb55   :  { %1624 = vst.msk [vmem:[#allocation5 + $0xd] sm:$0x2] %vm1603_vm11, %v1588_v42  ;;  %2646 = vpow2.f32 %v1777_v41 }
 0xb57   :  { %v1772_v43 = vpop.xlane.xlu1 %1771 }
 0xb58   :  { %v1776_v44 = vsub.f32 %v2458_v32, %v1772_v43 }
 0xb5a   :  { %v1783_v45 = vmul.f32 1.442695, %v1776_v44 }
 0xb5b   :  { %v1769_v46 = vpop.xlane.xlu1 %1768 }
 0xb5c   :  { %2648 = vpow2.f32 %v1783_v45  ;;  %v1775_v47 = vsub.f32 %v1752_v33, %v1769_v46 }
 0xb5e   :  { %v2645_v48 = vpop.eup %2644  ;;  %v1781_v49 = vmul.f32 1.442695, %v1775_v47 }
 0xb5f   :  { %v1558_v50 = vpop.permute.xlu1 %1557  ;;  %v1788_v51 = vsel %vm160_vm3, %v2645_v48, 0.0  ;;  %v2647_v52 = vpop.eup %2646 }
 0xb60   :  { %2650 = vpow2.f32 %v1781_v49  ;;  %1560 = vst.msk [vmem:[#allocation5 + $0x3] sm:$0x1] %vm237_vm4, %v1558_v50  ;;  %1789 = vadd.xlane.f32.xlu1 %v1788_v51  ;;  %v1785_v54 = vsel %vm160_vm3, %v2647_v52, 0.0 }
 0xb61   :  { %1615 = vst.msk [vmem:[#allocation5 + $0xa] sm:$0x2] %vm1603_vm11, %v1558_v50 }
 0xb63   :  { %v1576_v53 = vpop.permute.xlu1 %1575 }
 0xb64   :  { %1578 = vst.msk [vmem:[#allocation5 + $0x5] sm:$0x1] %vm237_vm4, %v1576_v53  ;;  %1786 = vadd.xlane.f32.xlu1 %v1785_v54 }
 0xb65   :  { %1621 = vst.msk [vmem:[#allocation5 + $0xc] sm:$0x2] %vm1603_vm11, %v1576_v53 }
 0xb66   :  { %v2649_v55 = vpop.eup %2648 }
 0xb67   :  { %v1794_v13 = vsel %vm160_vm3, %v2649_v55, 0.0 }
 0xb68   :  { %1795 = vadd.xlane.f32.xlu1 %v1794_v13 }
 0xb6a   :  { %v2651_v23 = vpop.eup %2650 }
 0xb6b   :  { %v1791_v56 = vsel %vm160_vm3, %v2651_v23, 0.0 }
 0xb6c   :  { %1792 = vadd.xlane.f32.xlu1 %v1791_v56 }
 0xb7d   :  { %1599 = vrot.lane.b32.xlu1 %v3252_v19, %s2728_s4  ;;  %s2175_s4 = sshll.u32 %s2731_s16, 4  ;;  %s2176_s4 = int_to_ptr.vmem [resolvable:$true] %s2175_s4 }
 0xb7e   :  { %s2676_s29 = scalar_lea.vmem %s2176_s4, 1024  ;;  %p2681_p1 = scmp.lt.s32.totalorder %s2176_s4, %s2176_s4 }
 0xb7f   :  { %p2677_p0 = scmp.ne.s32.totalorder %s2176_s4, %s2676_s29  ;;  %p2682_p2 = scmp.lt.s32.totalorder %s2676_s29, %s2676_s29 }
 0xb81   :  { %p2683_p3 = por %p2682_p2, %p2681_p1 }
 0xb83   :  { %p2684_p4 = pnand %p2683_p3, %p2677_p0 }
 0xba6   :  { %1899 = vxpose.xlu1.b32.start.end [1/1] (short) (narrow) %v1896_v57, 32 }
 0xbed   :  { %v1790_v58 = vpop.xlane.xlu1 %1789 }
 0xbee   :  { %2652 = vrcp.f32 %v1790_v58 }
 0xbf1   :  { %v1787_v59 = vpop.xlane.xlu1 %1786 }
 0xbf2   :  { %2654 = vrcp.f32 %v1787_v59 }
 0xbf5   :  { %v1796_v60 = vpop.xlane.xlu1 %1795 }
 0xbf6   :  { %2656 = vrcp.f32 %v1796_v60 }
 0xbf8   :  { %v2653_v61 = vpop.eup %2652 }
 0xbf9   :  { %v1793_v62 = vpop.xlane.xlu1 %1792  ;;  %v1802_v63 = vmul.f32 %v2653_v61, %v2645_v48 }
 0xbfa   :  { %2658 = vrcp.f32 %v1793_v62 }
 0xbfb   :  { %1806 = vst.msk [vmem:[#allocation8 + $0x8] sm:$0xff] %vm160_vm3, %v1802_v63 }
 0xbfc   :  { %v2655_v24 = vpop.eup %2654 }
 0xbfd   :  { %v1600_v0 = vpop.permute.xlu1 %1599  ;;  %v1801_v1 = vmul.f32 %v2655_v24, %v2647_v52 }
 0xbfe   :  { %1602 = vst.msk [vmem:[#allocation5 + $0x7] sm:$0x1] %vm237_vm4, %v1600_v0 }
 0xbff   :  { %1627 = vst.msk [vmem:[#allocation5 + $0xe] sm:$0x2] %vm1603_vm11, %v1600_v0  ;;  %v2606_v2 = vpack.c.bf16 %v1802_v63, %v1801_v1 }
 0xc00   :  { %1805 = vst.msk [vmem:[#allocation8] sm:$0xff] %vm160_vm3, %v1801_v1  ;;  %v2657_v5 = vpop.eup %2656 }
 0xc01   :  { %2607 = vmatpush3.bf16.msra.mxu0 %v2606_v2  ;;  %v1804_v6 = vmul.f32 %v2657_v5, %v2649_v55 }
 0xc02   :  { %2608 = vmatprep.subr.bf16.mxu0 %v2724_v3 }
 0xc03   :  { %1808 = vst.msk [vmem:[#allocation8 + $0x18] sm:$0xff] %vm160_vm3, %v1804_v6 }
 0xc04   :  { %v2659_v7 = vpop.eup %2658 }
 0xc05   :  { %v1803_v8 = vmul.f32 %v2659_v7, %v2651_v23  ;;  %v1630_v14 = vld [vmem:[#allocation5] sm:$0xff] }
 0xc06   :  { %v1898_v60 = vld [vmem:[#allocation5 + $0x8] sm:$0xff] }
 0xc07   :  { %1807 = vst.msk [vmem:[#allocation8 + $0x10] sm:$0xff] %vm160_vm3, %v1803_v8  ;;  %v2609_v11 = vpack.c.bf16 %v1804_v6, %v1803_v8 }
 0xc09   :  { %2610 = vmatpush3.bf16.msra.mxu0 %v2609_v11 }
 0xc0a   :  { %2470 = vmatprep.subr.mxu0 %v1897_v12 }
 0xc0c   :  { %2468 = vmatmul.mubr.msk.f32.vlgmr.msra.gmra.mrb[20].mxu0 %vm160_vm3, %v1630_v14 }
 0xc0d   :  { %2471 = vmatpush3.msra.mxu0 %v1897_v12 }
 0xc0e   :  { %2611 = vmatprep.subr.bf16.mxu0 %v2724_v3 }
 0xc26   :  { %v1915_v15 = vpop.trf.xlu1 }
 0xc27   :  { %2472 = vmatprep.mubr.msk.f32.mxu0 %vm1663_vm12, %v1915_v15 }
 0xc2a   :  { %v1916_v16 = vpop.trf.xlu1 }
 0xc2b   :  { %2473 = vmatmul.mubr.msk.f32.vlgmr.msra.gmra.mrb[22].mxu0 %vm1663_vm12, %v1916_v16 }
 0xc2e   :  { %v1917_v4 = vpop.trf.xlu1 }
 0xc2f   :  { %2475 = vmatprep.mubr.msk.f32.mxu0 %vm1663_vm12, %v1917_v4 }
 0xc32   :  { %v1918_v17 = vpop.trf.xlu1 }
 0xc33   :  { %2476 = vmatmul.mubr.msk.f32.gmra.mrb[24].mxu0 %vm1663_vm12, %v1918_v17 }
 0xc34   :  { %2486 = vmatprep.mubr.msk.f32.mxu0 %vm2725_vm2, %v2726_v10 }
 0xcdf   :  { %v1878_v18 = vpop.f32.mrb[20].mxu0 }
 0xce0   :  { %1882 = vst.msk [vmem:[#allocation6] sm:$0x1] %vm237_vm4, %v1878_v18  ;;  %v2469_v10 = vpop.f32.mrb[21].mxu0 }
 0xce1   :  { %1883 = vst.msk [vmem:[#allocation6 + $0x1] sm:$0x2] %vm1603_vm11, %v1878_v18 }
 0xce2   :  { %1885 = vst.msk [vmem:[#allocation6 + $0x2] sm:$0x4] %vm1884_vm13, %v1878_v18 }
 0xce3   :  { %1887 = vst.msk [vmem:[#allocation6 + $0x3] sm:$0x8] %vm1886_vm14, %v1878_v18 }
 0xce4   :  { %1889 = vst.msk [vmem:[#allocation6 + $0x4] sm:$0x10] %vm1888_vm15, %v1878_v18 }
 0xce5   :  { %1891 = vst.msk [vmem:[#allocation6 + $0x5] sm:$0x20] %vm1890_vm0, %v1878_v18 }
 0xce6   :  { %1893 = vst.msk [vmem:[#allocation6 + $0x6] sm:$0x40] %vm1892_vm1, %v1878_v18 }
 0xce7   :  { %1895 = vst.msk [vmem:[#allocation6 + $0x7] sm:$0x80] %vm1894_vm5, %v1878_v18 }
 0xcfe   :  { %v2474_v19 = vpop.f32.mrb[22].mxu0 }
 0xcff   :  { %v2009_v20 = vpop.f32.mrb[23].mxu0  ;;  %v2031_v21 = vsel %vm160_vm3, %v2474_v19, -inf }
 0xd00   :  { %2032 = vmax.xlane.f32.xlu1 %v2031_v21  ;;  %v2028_v9 = vsel %vm160_vm3, %v2009_v20, -inf }
 0xd01   :  { %2029 = vmax.xlane.f32.xlu0 %v2028_v9 }
 0xd06   :  { %v2477_v22 = vpop.f32.mrb[24].mxu0 }
 0xd07   :  { %v2019_v25 = vpop.f32.mrb[25].mxu0  ;;  %v2037_v27 = vsel %vm160_vm3, %v2477_v22, -inf }
 0xd08   :  { %v2034_v26 = vsel %vm160_vm3, %v2019_v25, -inf }
 0xd09   :  { %2035 = vmax.xlane.f32.xlu0 %v2034_v26 }
 0xd0d   :  { %2038 = vmax.xlane.f32.xlu0 %v2037_v27 }
 0xd8d   :  { %v2033_v28 = vpop.xlane.xlu1 %2032 }
 0xd8e   :  { %v2041_v29 = vsub.f32 %v2474_v19, %v2033_v28  ;;  %v2030_v30 = vpop.xlane.xlu0 %2029 }
 0xd8f   :  { %v2040_v31 = vsub.f32 %v2009_v20, %v2030_v30 }
 0xd90   :  { %v2046_v32 = vmul.f32 1.442695, %v2041_v29 }
 0xd91   :  { %v2044_v33 = vmul.f32 1.442695, %v2040_v31 }
 0xd92   :  { %2660 = vpow2.f32 %v2046_v32 }
 0xd93   :  { %2662 = vpow2.f32 %v2044_v33 }
 0xd96   :  { %v2036_v34 = vpop.xlane.xlu0 %2035 }
 0xd97   :  { %v2042_v35 = vsub.f32 %v2019_v25, %v2036_v34 }
 0xd99   :  { %v2048_v36 = vmul.f32 1.442695, %v2042_v35 }
 0xd9a   :  { %v2039_v37 = vpop.xlane.xlu0 %2038 }
 0xd9b   :  { %2664 = vpow2.f32 %v2048_v36  ;;  %v2043_v38 = vsub.f32 %v2477_v22, %v2039_v37 }
 0xd9c   :  { %v2661_v39 = vpop.eup %2660 }
 0xd9d   :  { %v2050_v40 = vmul.f32 1.442695, %v2043_v38  ;;  %v2055_v41 = vsel %vm160_vm3, %v2661_v39, 0.0  ;;  %v2663_v42 = vpop.eup %2662 }
 0xd9e   :  { %2056 = vadd.xlane.f32.xlu0 %v2055_v41  ;;  %v2052_v43 = vsel %vm160_vm3, %v2663_v42, 0.0 }
 0xd9f   :  { %2666 = vpow2.f32 %v2050_v40 }
 0xda2   :  { %2053 = vadd.xlane.f32.xlu0 %v2052_v43 }
 0xda5   :  { %v2665_v44 = vpop.eup %2664 }
 0xda6   :  { %v2058_v45 = vsel %vm160_vm3, %v2665_v44, 0.0 }
 0xda7   :  { %2059 = vadd.xlane.f32.xlu0 %v2058_v45 }
 0xda9   :  { %v2667_v46 = vpop.eup %2666 }
 0xdaa   :  { %v2061_v47 = vsel %vm160_vm3, %v2667_v46, 0.0 }
 0xdab   :  { %2062 = vadd.xlane.f32.xlu0 %v2061_v47 }
 0xe2b   :  { %v2057_v48 = vpop.xlane.xlu0 %2056 }
 0xe2c   :  { %2668 = vrcp.f32 %v2057_v48 }
 0xe2f   :  { %v2054_v49 = vpop.xlane.xlu0 %2053 }
 0xe30   :  { %2670 = vrcp.f32 %v2054_v49 }
 0xe34   :  { %v2060_v50 = vpop.xlane.xlu0 %2059 }
 0xe35   :  { %2672 = vrcp.f32 %v2060_v50 }
 0xe36   :  { %v2669_v51 = vpop.eup %2668 }
 0xe37   :  { %v2069_v52 = vmul.f32 %v2669_v51, %v2661_v39 }
 0xe38   :  { %v2063_v53 = vpop.xlane.xlu0 %2062 }
 0xe39   :  { %2674 = vrcp.f32 %v2063_v53  ;;  %2074 = vst.msk [vmem:[#allocation8 + $0x28] sm:$0xff] %vm160_vm3, %v2069_v52 }
 0xe3a   :  { %v2671_v54 = vpop.eup %2670 }
 0xe3b   :  { %v2068_v55 = vmul.f32 %v2671_v54, %v2663_v42 }
 0xe3d   :  { %2073 = vst.msk [vmem:[#allocation8 + $0x20] sm:$0xff] %vm160_vm3, %v2068_v55  ;;  %v2612_v13 = vpack.c.bf16 %v2069_v52, %v2068_v55 }
 0xe3f   :  { %v2673_v23 = vpop.eup %2672  ;;  %2613 = vmatpush3.bf16.msra.mxu0 %v2612_v13 }
 0xe40   :  { %2614 = vmatprep.subr.bf16.mxu0 %v2724_v3  ;;  %v2070_v56 = vmul.f32 %v2673_v23, %v2665_v44 }
 0xe42   :  { %2075 = vst.msk [vmem:[#allocation8 + $0x30] sm:$0xff] %vm160_vm3, %v2070_v56 }
 0xe43   :  { %v2675_v57 = vpop.eup %2674 }
 0xe44   :  { %v2071_v58 = vmul.f32 %v2675_v57, %v2667_v46 }
 0xe46   :  { %2076 = vst.msk [vmem:[#allocation8 + $0x38] sm:$0xff] %vm160_vm3, %v2071_v58  ;;  %v2615_v59 = vpack.c.bf16 %v2071_v58, %v2070_v56 }
 0xe48   :  { %2616 = vmatpush3.bf16.msra.mxu0 %v2615_v59 }
 0xe4b   :  { %2487 = vmatmul.mubr.msk.f32.vlgmr.msra.gmra.mrb[26].mxu0 %vm160_vm3, %v1898_v60 }
 0xe4c   :  { %2687 = shalt.err (!%p2684_p4)
}
 0xe4d   :  { %s2688_s21 = scalar_lea.hbm %s3387_s18, 1024 }
 0xe4e   :  { %p2689_p5 = scmp.ne.s32.totalorder %s3387_s18, %s2688_s21  ;;  %p2692_p6 = scmp.lt.u32.totalorder %s2688_s21, %s3387_s18 }
 0xe50   :  { %p2694_p7 = pnand %p2692_p6, %p2689_p5 }
 0xe52   :  { %2697 = shalt.err (!%p2694_p7)
}
 0xe53   :  { %s2732_s2 = smov 128   ;;  %s2733_s23 = smov 8  }
 0xe54   :  { %2181 = dma.vmem_to_hbm [thread:$0]  %s2176_s4, 1024, %s3387_s18, [#allocation9], %s2732_s2, %s2732_s2, %s2733_s23  }
 0xe55   :  { %s2734_s26 = smov [#allocation6]  }
 0xe56   :  { %s2163_s10 = sshll.u32 %s2734_s26, 4  ;;  %s2164_s10 = int_to_ptr.vmem [resolvable:$true] %s2163_s10 }
 0xe57   :  { %s2698_s18 = scalar_lea.vmem %s2164_s10, 256  ;;  %p2703_p9 = scmp.lt.s32.totalorder %s2164_s10, %s2164_s10 }
 0xe58   :  { %p2699_p8 = scmp.ne.s32.totalorder %s2164_s10, %s2698_s18  ;;  %p2704_p10 = scmp.lt.s32.totalorder %s2698_s18, %s2698_s18 }
 0xe5a   :  { %p2705_p11 = por %p2704_p10, %p2703_p9 }
 0xe5c   :  { %p2706_p12 = pnand %p2705_p11, %p2699_p8 }
 0xf1e   :  { %v2146_v3 = vpop.f32.mrb[26].mxu0 }
 0xf1f   :  { %2150 = vst.msk [vmem:[#allocation6 + $0x1] sm:$0x1] %vm237_vm4, %v2146_v3  ;;  %v2488_v61 = vpop.f32.mrb[27].mxu0 }
 0xf20   :  { %2151 = vst.msk [vmem:[#allocation6 + $0x2] sm:$0x2] %vm1603_vm11, %v2146_v3 }
 0xf21   :  { %2152 = vst.msk [vmem:[#allocation6 + $0x3] sm:$0x4] %vm1884_vm13, %v2146_v3 }
 0xf22   :  { %2153 = vst.msk [vmem:[#allocation6 + $0x4] sm:$0x8] %vm1886_vm14, %v2146_v3 }
 0xf23   :  { %2154 = vst.msk [vmem:[#allocation6 + $0x5] sm:$0x10] %vm1888_vm15, %v2146_v3 }
 0xf24   :  { %2155 = vst.msk [vmem:[#allocation6 + $0x6] sm:$0x20] %vm1890_vm0, %v2146_v3 }
 0xf25   :  { %2156 = vst.msk [vmem:[#allocation6 + $0x7] sm:$0x40] %vm1892_vm1, %v2146_v3 }
 0xf26   :  { %2157 = vst.msk [vmem:[#allocation6 + $0x8] sm:$0x80] %vm1894_vm5, %v2146_v3 }
 0xf27   :  { %2709 = shalt.err (!%p2706_p12)
}
 0xf28   :  { %s2710_s3 = scalar_lea.hbm %s3386_s17, 256 }
 0xf29   :  { %p2711_p13 = scmp.ne.s32.totalorder %s3386_s17, %s2710_s3  ;;  %p2714_p0 = scmp.lt.u32.totalorder %s2710_s3, %s3386_s17 }
 0xf2b   :  { %p2716_p1 = pnand %p2714_p0, %p2711_p13 }
 0xf2d   :  { %2719 = shalt.err (!%p2716_p1)
}
 0xf2e   :  { %2169 = dma.vmem_to_hbm [thread:$0]  %s2164_s10, 256, %s3386_s17, [#allocation7], %s2732_s2, %s2732_s2, %s2733_s23  }
 0xf2f   :  { %2720 = dma.done.wait [#allocation7], 256  }
 0xf30   :  { %2721 = vsyncadd [#allocation7], 4294967040 }
 0xf31   :  { %2722 = dma.done.wait [#allocation9], 1024  }
 0xf32   :  { %2723 = vsyncadd [#allocation9], 4294966272 }
 0xf33   :  { %2188 = vsyncpa [#allocation7], 1 }
 0xf34   :  { %2189 = vsyncpa [#allocation9], 1 }

</bundles_post_ra>
